<compile_context>
chip_gen: v7x
topology: tpu7x:2x2x1
jax: 0.10.0
libtpu: 0.0.40
codegen_flags: <defaults>
</compile_context>

<pallas_src>
import functools

import jax
import jax.numpy as jnp
from jax.experimental import pallas as pl
from jax.experimental.pallas import tpu as pltpu


def _elu_plus_one(x):
    # elu(x) + 1 == x + 1 for x > 0 else exp(x); min() keeps the unselected branch finite.
    return jnp.where(x > 0.0, x + 1.0, jnp.exp(jnp.minimum(x, 0.0)))


def _linear_attention_kernel(*refs, eps, has_q_mask, has_kv_mask, compute_dtype):
    q_ref, k_ref, v_ref = refs[0], refs[1], refs[2]
    idx = 3
    qm_ref = km_ref = None
    if has_q_mask:
        qm_ref = refs[idx]
        idx += 1
    if has_kv_mask:
        km_ref = refs[idx]
        idx += 1
    o_ref = refs[idx]

    # One grid step == one batch element, all heads at once.
    q = q_ref[0].astype(jnp.float32)   # (H, L, D)
    k = k_ref[0].astype(jnp.float32)   # (H, S, D)
    v = v_ref[0].astype(jnp.float32)   # (H, S, Dv)

    qf = _elu_plus_one(q)
    kf = _elu_plus_one(k)

    if has_kv_mask:
        # (S, 1) column mask broadcasts over heads (major) and lanes.  Masking kf alone
        # also zeroes the masked rows' contribution to kf^T @ v, so v needs no mask.
        kf = kf * km_ref[0]

    # MXU matmuls: optionally bf16 inputs (v6e/v7x fast path), always f32 accumulation.
    qf_mm = qf.astype(compute_dtype)
    kf_mm = kf.astype(compute_dtype)
    v_mm = v.astype(compute_dtype)

    # kv[h] = kf[h]^T @ v[h]                    -> (H, D, Dv)
    kv = jnp.einsum('hsd,hse->hde', kf_mm, v_mm,
                    preferred_element_type=jnp.float32)
    # y_pre[h] = qf[h] @ kv[h]                  -> (H, L, Dv)
    y_pre = jnp.einsum('hld,hde->hle', qf_mm, kv.astype(compute_dtype),
                       preferred_element_type=jnp.float32)

    # Normalizer in f32 on the VPU/XLU; keepdims shapes only (no relayouts).
    ksum = jnp.sum(kf, axis=1, keepdims=True)                    # (H, 1, D)
    denom = jnp.sum(qf * ksum, axis=-1, keepdims=True) + eps     # (H, L, 1)
    z = 1.0 / denom                                              # tiny tensor; exact divide
    if has_q_mask:
        z = z * qm_ref[0]          # (L, 1) column mask -> padded query rows become 0

    o_ref[0] = (y_pre * z).astype(o_ref.dtype)


def linear_attention(q, k, v, q_mask=None, kv_mask=None, *,
                     eps=1e-6, use_bf16_matmul=False):
    """Pallas-TPU equivalent of LinearAttention.forward."""
    B, H, L, D = q.shape
    S = k.shape[2]
    Dv = v.shape[3]
    assert k.shape == (B, H, S, D), k.shape
    assert v.shape == (B, H, S, Dv), v.shape

    has_q_mask = q_mask is not None
    has_kv_mask = kv_mask is not None

    args = [q, k, v]
    in_specs = [
        pl.BlockSpec((1, H, L, D), lambda b: (b, 0, 0, 0)),
        pl.BlockSpec((1, H, S, D), lambda b: (b, 0, 0, 0)),
        pl.BlockSpec((1, H, S, Dv), lambda b: (b, 0, 0, 0)),
    ]
    if has_q_mask:
        # Column-form (L, 1) blocks broadcast along the sublane axis directly,
        # avoiding any in-kernel relayout of the mask.
        args.append(q_mask.astype(jnp.float32).reshape(B, L, 1))
        in_specs.append(pl.BlockSpec((1, L, 1), lambda b: (b, 0, 0)))
    if has_kv_mask:
        args.append(kv_mask.astype(jnp.float32).reshape(B, S, 1))
        in_specs.append(pl.BlockSpec((1, S, 1), lambda b: (b, 0, 0)))

    kernel = functools.partial(
        _linear_attention_kernel,
        eps=float(eps),
        has_q_mask=has_q_mask,
        has_kv_mask=has_kv_mask,
        compute_dtype=jnp.bfloat16 if use_bf16_matmul else jnp.float32,
    )

    # TODO(synk): for production LoFTR lengths (L, S ~ 5k) add a query-tile grid axis and
    # accumulate kv/ksum over an 'arbitrary' S axis (with vmem_limit_bytes raised) instead
    # of whole-(L, S) blocks per step; unnecessary at these sizes.
    return pl.pallas_call(
        kernel,
        out_shape=jax.ShapeDtypeStruct((B, H, L, Dv), q.dtype),
        grid_spec=pltpu.PrefetchScalarGridSpec(
            num_scalar_prefetch=0,
            grid=(B,),                              # one fat step per batch element
            in_specs=in_specs,
            out_specs=pl.BlockSpec((1, H, L, Dv), lambda b: (b, 0, 0, 0)),
        ),
        compiler_params=pltpu.CompilerParams(
            dimension_semantics=("parallel",)),
    )(*args)


def _reference(q, k, v, q_mask=None, kv_mask=None, eps=1e-6):
    """Pure-JAX transcription of the PyTorch LinearAttention.forward."""
    S = k.shape[2]
    hp = jax.lax.Precision.HIGHEST
    qf = jax.nn.elu(q) + 1.0
    kf = jax.nn.elu(k) + 1.0
    if q_mask is not None:
        qf = qf * q_mask[:, None, :, None].astype(qf.dtype)
    if kv_mask is not None:
        kf = kf * kv_mask[:, None, :, None].astype(kf.dtype)
        v = v * kv_mask[:, None, :, None].astype(v.dtype)
    v = v / S
    kv = jnp.einsum('bhsd,bhse->bhde', kf, v, precision=hp)
    z = 1.0 / (jnp.einsum('bhld,bhd->bhl', qf, jnp.sum(kf, axis=2), precision=hp) + eps)
    return jnp.einsum('bhld,bhde->bhle', qf, kv, precision=hp) * z[..., None] * S


if __name__ == "__main__":
    B, H, L, S, D, Dv = 2, 4, 64, 64, 32, 32
    key = jax.random.PRNGKey(0)
    kq, kk, kv_key = jax.random.split(key, 3)
    q = jax.random.normal(kq, (B, H, L, D), jnp.float32)
    k = jax.random.normal(kk, (B, H, S, D), jnp.float32)
    v = jax.random.normal(kv_key, (B, H, S, Dv), jnp.float32)

    # LoFTR-style padding masks: last 16 query rows / last 8 key rows of batch 1 padded.
    q_mask = jnp.ones((B, L), jnp.bool_).at[1, L - 16:].set(False)
    kv_mask = jnp.ones((B, S), jnp.bool_).at[1, S - 8:].set(False)

    def rel_err(a, b):
        return float(jnp.max(jnp.abs(a - b)) / (jnp.max(jnp.abs(b)) + 1e-9))

    # 1) masked, f32 matmuls: must match the pure-JAX reference
    y = jax.block_until_ready(linear_attention(q, k, v, q_mask, kv_mask))
    ref = _reference(q, k, v, q_mask, kv_mask)
    assert y.shape == (B, H, L, Dv)
    e1 = rel_err(y, ref)
    assert e1 < 5e-3, f"masked f32 mismatch: rel err {e1}"

    # 2) no masks: exercises the trace-time fast path (mask inputs / DMAs elided)
    y_nm = jax.block_until_ready(linear_attention(q, k, v))
    e2 = rel_err(y_nm, _reference(q, k, v))
    assert e2 < 5e-3, f"unmasked f32 mismatch: rel err {e2}"

    # 3) bf16 matmul inputs (f32 accumulation, f32 normalizer) — v6e/v7x MXU fast path
    y_bf = jax.block_until_ready(
        linear_attention(q, k, v, q_mask, kv_mask, use_bf16_matmul=True))
    e3 = rel_err(y_bf, ref)
    assert e3 < 3e-2, f"bf16-matmul path too far from reference: rel err {e3}"

    print("KERNEL_OK")
</pallas_src>

<mosaic_0001>
module attributes {stable_mosaic.version = 11 : i64} {
  func.func @_linear_attention_kernel(%arg0: i32, %arg1: memref<1x4x64x32xf32, #tpu.memory_space<vmem>>, %arg2: memref<1x4x64x32xf32, #tpu.memory_space<vmem>>, %arg3: memref<1x4x64x32xf32, #tpu.memory_space<vmem>>, %arg4: memref<1x64x1xf32, #tpu.memory_space<vmem>>, %arg5: memref<1x64x1xf32, #tpu.memory_space<vmem>>, %arg6: memref<1x4x64x32xf32, #tpu.memory_space<vmem>>) attributes {dimension_semantics = [#tpu.dimension_semantics<parallel>], iteration_bounds = array<i64: 2>, scalar_prefetch = 0 : i64, scratch_operands = 0 : i64, tpu.core_type = #tpu.core_type<tc>, window_params = [{transform_indices = @transform_0, window_bounds = array<i64: 1, 4, 64, 32>}, {transform_indices = @transform_1, window_bounds = array<i64: 1, 4, 64, 32>}, {transform_indices = @transform_2, window_bounds = array<i64: 1, 4, 64, 32>}, {transform_indices = @transform_3, window_bounds = array<i64: 1, 64, 1>}, {transform_indices = @transform_4, window_bounds = array<i64: 1, 64, 1>}, {transform_indices = @transform_5, window_bounds = array<i64: 1, 4, 64, 32>}]} {
    %c0 = arith.constant 0 : index
    %c0_0 = arith.constant 0 : index
    %c0_1 = arith.constant 0 : index
    %c0_2 = arith.constant 0 : index
    %0 = vector.load %arg1[%c0, %c0_0, %c0_1, %c0_2] : memref<1x4x64x32xf32, #tpu.memory_space<vmem>>, vector<1x4x64x32xf32>
    %1 = vector.shape_cast %0 : vector<1x4x64x32xf32> to vector<4x64x32xf32>
    %c0_3 = arith.constant 0 : index
    %c0_4 = arith.constant 0 : index
    %c0_5 = arith.constant 0 : index
    %c0_6 = arith.constant 0 : index
    %2 = vector.load %arg2[%c0_3, %c0_4, %c0_5, %c0_6] : memref<1x4x64x32xf32, #tpu.memory_space<vmem>>, vector<1x4x64x32xf32>
    %3 = vector.shape_cast %2 : vector<1x4x64x32xf32> to vector<4x64x32xf32>
    %c0_7 = arith.constant 0 : index
    %c0_8 = arith.constant 0 : index
    %c0_9 = arith.constant 0 : index
    %c0_10 = arith.constant 0 : index
    %4 = vector.load %arg3[%c0_7, %c0_8, %c0_9, %c0_10] : memref<1x4x64x32xf32, #tpu.memory_space<vmem>>, vector<1x4x64x32xf32>
    %5 = vector.shape_cast %4 : vector<1x4x64x32xf32> to vector<4x64x32xf32>
    %cst = arith.constant 0.000000e+00 : f32
    %6 = vector.broadcast %cst : f32 to vector<4x64x32xf32>
    %7 = arith.cmpf ogt, %1, %6 : vector<4x64x32xf32>
    %cst_11 = arith.constant 1.000000e+00 : f32
    %8 = vector.broadcast %cst_11 : f32 to vector<4x64x32xf32>
    %9 = arith.addf %1, %8 : vector<4x64x32xf32>
    %cst_12 = arith.constant 0.000000e+00 : f32
    %10 = vector.broadcast %cst_12 : f32 to vector<4x64x32xf32>
    %11 = arith.minimumf %1, %10 : vector<4x64x32xf32>
    %12 = math.exp %11 : vector<4x64x32xf32>
    %13 = arith.select %7, %9, %12 : vector<4x64x32xi1>, vector<4x64x32xf32>
    %cst_13 = arith.constant 0.000000e+00 : f32
    %14 = vector.broadcast %cst_13 : f32 to vector<4x64x32xf32>
    %15 = arith.cmpf ogt, %3, %14 : vector<4x64x32xf32>
    %cst_14 = arith.constant 1.000000e+00 : f32
    %16 = vector.broadcast %cst_14 : f32 to vector<4x64x32xf32>
    %17 = arith.addf %3, %16 : vector<4x64x32xf32>
    %cst_15 = arith.constant 0.000000e+00 : f32
    %18 = vector.broadcast %cst_15 : f32 to vector<4x64x32xf32>
    %19 = arith.minimumf %3, %18 : vector<4x64x32xf32>
    %20 = math.exp %19 : vector<4x64x32xf32>
    %21 = arith.select %15, %17, %20 : vector<4x64x32xi1>, vector<4x64x32xf32>
    %c0_16 = arith.constant 0 : index
    %c0_17 = arith.constant 0 : index
    %c0_18 = arith.constant 0 : index
    %22 = vector.load %arg5[%c0_16, %c0_17, %c0_18] : memref<1x64x1xf32, #tpu.memory_space<vmem>>, vector<1x64x1xf32>
    %23 = vector.shape_cast %22 : vector<1x64x1xf32> to vector<64x1xf32>
    %24 = vector.shape_cast %23 : vector<64x1xf32> to vector<1x64x1xf32>
    %25 = vector.broadcast %24 : vector<1x64x1xf32> to vector<4x64x32xf32>
    %26 = arith.mulf %21, %25 : vector<4x64x32xf32>
    "tpu.trace_start"() <{level = 10 : i32, message = "hsd,hse->hde"}> : () -> ()
    %cst_19 = arith.constant dense<0.000000e+00> : vector<4x32x32xf32>
    %27 = tpu.matmul %26, %5, %cst_19 {dimension_numbers = #tpu.dot_dimension_numbers<[1], [1], [2], [2], [0, 0, 0, 2, 1, 2], [0], [0]>} : vector<4x64x32xf32>, vector<4x64x32xf32>, vector<4x32x32xf32> -> vector<4x32x32xf32>
    "tpu.trace_stop"() : () -> ()
    "tpu.trace_start"() <{level = 10 : i32, message = "hld,hde->hle"}> : () -> ()
    %cst_20 = arith.constant dense<0.000000e+00> : vector<4x64x32xf32>
    %28 = tpu.matmul %13, %27, %cst_20 {dimension_numbers = #tpu.dot_dimension_numbers<[2], [1], [1], [2], [0, 0, 0, 1, 1, 2], [0], [0]>} : vector<4x64x32xf32>, vector<4x32x32xf32>, vector<4x64x32xf32> -> vector<4x64x32xf32>
    "tpu.trace_stop"() : () -> ()
    %cst_21 = arith.constant dense<0.000000e+00> : vector<4x32xf32>
    %29 = vector.multi_reduction <add>, %26, %cst_21 [1] : vector<4x64x32xf32> to vector<4x32xf32>
    %30 = vector.shape_cast %29 : vector<4x32xf32> to vector<4x1x32xf32>
    %31 = vector.broadcast %30 : vector<4x1x32xf32> to vector<4x64x32xf32>
    %32 = arith.mulf %13, %31 : vector<4x64x32xf32>
    %cst_22 = arith.constant dense<0.000000e+00> : vector<4x64xf32>
    %33 = vector.multi_reduction <add>, %32, %cst_22 [2] : vector<4x64x32xf32> to vector<4x64xf32>
    %34 = vector.shape_cast %33 : vector<4x64xf32> to vector<4x64x1xf32>
    %cst_23 = arith.constant 9.99999997E-7 : f32
    %35 = vector.broadcast %cst_23 : f32 to vector<4x64x1xf32>
    %36 = arith.addf %34, %35 : vector<4x64x1xf32>
    %cst_24 = arith.constant 1.000000e+00 : f32
    %37 = vector.broadcast %cst_24 : f32 to vector<4x64x1xf32>
    %38 = arith.divf %37, %36 : vector<4x64x1xf32>
    %c0_25 = arith.constant 0 : index
    %c0_26 = arith.constant 0 : index
    %c0_27 = arith.constant 0 : index
    %39 = vector.load %arg4[%c0_25, %c0_26, %c0_27] : memref<1x64x1xf32, #tpu.memory_space<vmem>>, vector<1x64x1xf32>
    %40 = vector.shape_cast %39 : vector<1x64x1xf32> to vector<64x1xf32>
    %41 = vector.shape_cast %40 : vector<64x1xf32> to vector<1x64x1xf32>
    %42 = vector.broadcast %41 : vector<1x64x1xf32> to vector<4x64x1xf32>
    %43 = arith.mulf %38, %42 : vector<4x64x1xf32>
    %44 = vector.broadcast %43 : vector<4x64x1xf32> to vector<4x64x32xf32>
    %45 = arith.mulf %28, %44 : vector<4x64x32xf32>
    %c0_28 = arith.constant 0 : index
    %c0_29 = arith.constant 0 : index
    %c0_30 = arith.constant 0 : index
    %c0_31 = arith.constant 0 : index
    %46 = vector.load %arg6[%c0_28, %c0_29, %c0_30, %c0_31] : memref<1x4x64x32xf32, #tpu.memory_space<vmem>>, vector<1x4x64x32xf32>
    %47 = vector.shape_cast %46 : vector<1x4x64x32xf32> to vector<4x64x32xf32>
    %48 = vector.shape_cast %45 : vector<4x64x32xf32> to vector<1x4x64x32xf32>
    tpu.vector_store %arg6[%c0_28, %c0_29, %c0_30, %c0_31], %48 {strides = array<i32>} : memref<1x4x64x32xf32, #tpu.memory_space<vmem>>, vector<1x4x64x32xf32>,
    return
  }
  func.func @transform_0(%arg0: i32) -> (i32, i32, i32, i32) {
    %c0_i32 = arith.constant 0 : i32
    %c0_i32_0 = arith.constant 0 : i32
    %c0_i32_1 = arith.constant 0 : i32
    %c0_i32_2 = arith.constant 0 : i32
    return %arg0, %c0_i32, %c0_i32_0, %c0_i32_1 : i32, i32, i32, i32
  }
  func.func @transform_1(%arg0: i32) -> (i32, i32, i32, i32) {
    %c0_i32 = arith.constant 0 : i32
    %c0_i32_0 = arith.constant 0 : i32
    %c0_i32_1 = arith.constant 0 : i32
    %c0_i32_2 = arith.constant 0 : i32
    return %arg0, %c0_i32, %c0_i32_0, %c0_i32_1 : i32, i32, i32, i32
  }
  func.func @transform_2(%arg0: i32) -> (i32, i32, i32, i32) {
    %c0_i32 = arith.constant 0 : i32
    %c0_i32_0 = arith.constant 0 : i32
    %c0_i32_1 = arith.constant 0 : i32
    %c0_i32_2 = arith.constant 0 : i32
    return %arg0, %c0_i32, %c0_i32_0, %c0_i32_1 : i32, i32, i32, i32
  }
  func.func @transform_3(%arg0: i32) -> (i32, i32, i32) {
    %c0_i32 = arith.constant 0 : i32
    %c0_i32_0 = arith.constant 0 : i32
    %c0_i32_1 = arith.constant 0 : i32
    return %arg0, %c0_i32, %c0_i32_0 : i32, i32, i32
  }
  func.func @transform_4(%arg0: i32) -> (i32, i32, i32) {
    %c0_i32 = arith.constant 0 : i32
    %c0_i32_0 = arith.constant 0 : i32
    %c0_i32_1 = arith.constant 0 : i32
    return %arg0, %c0_i32, %c0_i32_0 : i32, i32, i32
  }
  func.func @transform_5(%arg0: i32) -> (i32, i32, i32, i32) {
    %c0_i32 = arith.constant 0 : i32
    %c0_i32_0 = arith.constant 0 : i32
    %c0_i32_1 = arith.constant 0 : i32
    %c0_i32_2 = arith.constant 0 : i32
    return %arg0, %c0_i32, %c0_i32_0, %c0_i32_1 : i32, i32, i32, i32
  }
}

</mosaic_0001>

<bundles_post_ra>
// kernel: tpu_custom_call.1
= control target key start
LH: loop header
LB: loop body
LE: loop exit
PB: predicated region body
PF: predicated region fallthrough
CT: control target
= control target key end

     0   :  { %s3250_s18 = smov 0   ;;  %s4543_s0 = inlined_call_operand.vmem [shape: f32[2,4,64,32], index: 0, kind: input, shape index: {}]   ;;  %s4544_s1 = inlined_call_operand.vmem [shape: f32[2,4,64,32], index: 1, kind: input, shape index: {}]   ;;  %s4545_s2 = inlined_call_operand.vmem [shape: f32[2,4,64,32], index: 2, kind: input, shape index: {}]   ;;  %s4546_s3 = inlined_call_operand.vmem [shape: f32[2,64,1], index: 3, kind: input, shape index: {}]   ;;  %s4547_s4 = inlined_call_operand.vmem [shape: f32[2,64,1], index: 4, kind: input, shape index: {}]   ;;  %s4548_s5 = inlined_call_operand.vmem [shape: f32[2,4,64,32], index: 5, kind: output, shape index: {}]  }
   0x1 LB: > { %s2574_s19 = sadd.s32 4294967295, %s3217_s18   ;;  %p2578_p0 = scmp.ge.s32.totalorder %s3217_s18, 1  ;;  %s3217_s18 = sphi %s3250_s18, %s15_s18  }
   0x2   : > { %p227_p1 = scmp.lt.s32.totalorder %s3217_s18, 3 }
   0x4   : > { %p228_p2 = pnand %p2578_p0, %p227_p1 }
   0x6   : > { %231 = sbr.rel (%p228_p2) target bundleno = 769 (0x301), region = 40 }
   0xd   : > { %p275_p3 = scmp.lt.s32.totalorder %s2574_s19, 1  ;;  %v3219_v0 = vmov 0  }
   0xe   : > { %3018 = vset.pattern.permute.xlu1 %v3219_v0  ;;  %3017 = vset.pattern.permute.xlu0 %v3219_v0 }
   0xf   : > { %s4592_s19 = smov (!%p275_p3, %s2574_s19), 1 }
  0x10   : > { %s2644_s20 = sshll.u32 %s4592_s19, 6  ;;  %s3267_s24 = sshll.u32 %s4592_s19, 8 }
  0x11   : > { %s299_s23 = scalar_lea.vmem %s4547_s4, %s2644_s20  ;;  %s3273_s27 = scalar_lea.vmem %s4544_s1, %s3267_s24 }
  0x12   : > { %v787_v1 = vld [vmem:[%s299_s23 + $0x10] sm:$0xff]  ;;  %v785_v2 = vld [vmem:[%s299_s23] sm:$0xff]  ;;  %v788_v3 = vld [vmem:[%s299_s23 + $0x18] sm:$0xff]  ;;  %s3565_s30 = scalar_lea.vmem %s4545_s2, %s3267_s24  ;;  %s3883_s8 = scalar_lea.vmem %s4543_s0, %s3267_s24 }
  0x13   : > { %805 = vperm.xlu1 %3018, %v787_v1   ;;  %795 = vperm.xlu0 %3017, %v785_v2   ;;  %v786_v4 = vld [vmem:[%s299_s23 + $0x8] sm:$0xff]  ;;  %v789_v6 = vld [vmem:[%s299_s23 + $0x20] sm:$0xff]  ;;  %v792_v7 = vld [vmem:[%s299_s23 + $0x38] sm:$0xff]  ;;  %s4343_s11 = scalar_lea.vmem %s4546_s3, %s2644_s20  ;;  %s4467_s14 = scalar_lea.vmem %s4548_s5, %s3267_s24 }
  0x14   : > { %v790_v5 = vld [vmem:[%s299_s23 + $0x28] sm:$0xff]  ;;  %v791_v8 = vld [vmem:[%s299_s23 + $0x30] sm:$0xff]  ;;  %v3290_v15 = vld [vmem:[%s3273_s27 + $0x40] sm:$0xff] }
  0x15   : > { %v3276_v9 = vld [vmem:[%s3273_s27 + $0x10] sm:$0xff]  ;;  %v3294_v17 = vld [vmem:[%s3273_s27] sm:$0xff]  ;;  %v3298_v19 = vld [vmem:[%s3273_s27 + $0x18] sm:$0xff]  ;;  %v665_v21 = vmin.f32 %v3290_v15, 0.0  ;;  %vm601_vm4 = vcmp.gt.f32.partialorder %v3290_v15, 0.0 }
  0x16   : > { %v3279_v10 = vld [vmem:[%s3273_s27 + $0x50] sm:$0xff]  ;;  %v659_v13 = vmin.f32 %v3276_v9, 0.0  ;;  %v3302_v22 = vld [vmem:[%s3273_s27 + $0x58] sm:$0xff]  ;;  %v657_v24 = vmin.f32 %v3294_v17, 0.0  ;;  %v660_v28 = vmin.f32 %v3298_v19, 0.0  ;;  %v3314_v31 = vld [vmem:[%s3273_s27 + $0x8] sm:$0xff] }
  0x17   : > { %810 = vperm.xlu1 %3018, %v788_v3   ;;  %800 = vperm.xlu0 %3017, %v786_v4   ;;  %v3282_v11 = vld [vmem:[%s3273_s27 + $0x90] sm:$0xff]  ;;  %v667_v14 = vmin.f32 %v3279_v10, 0.0  ;;  %v3306_v25 = vld [vmem:[%s3273_s27 + $0x98] sm:$0xff]  ;;  %v668_v30 = vmin.f32 %v3302_v22, 0.0  ;;  %v705_v32 = vmul.f32 1.442695, %v665_v21 }
  0x18   : > { %v3285_v12 = vld [vmem:[%s3273_s27 + $0xd0] sm:$0xff]  ;;  %v675_v16 = vmin.f32 %v3282_v11, 0.0  ;;  %v693_v20 = vmul.f32 1.442695, %v659_v13  ;;  %v3309_v27 = vld [vmem:[%s3273_s27 + $0xd8] sm:$0xff]  ;;  %v676_v33 = vmin.f32 %v3306_v25, 0.0 }
  0x19   : > { %v683_v18 = vmin.f32 %v3285_v12, 0.0  ;;  %v709_v23 = vmul.f32 1.442695, %v667_v14  ;;  %v3318_v34 = vld [vmem:[%s3273_s27 + $0x48] sm:$0xff]  ;;  %v689_v35 = vmul.f32 1.442695, %v657_v24 }
  0x1a   : > { %v725_v26 = vmul.f32 1.442695, %v675_v16  ;;  %3019 = vpow2.f32 %v693_v20  ;;  %4565 = vst [vmem:[#allocation2_spill] sm:$0xff] %v3318_v34  ;;  %v684_v36 = vmin.f32 %v3309_v27, 0.0  ;;  %v3322_v37 = vld [vmem:[%s3273_s27 + $0x88] sm:$0xff]  ;;  %v658_v40 = vmin.f32 %v3314_v31, 0.0 }
  0x1b   : > { %820 = vperm.xlu1 %3018, %v790_v5   ;;  %815 = vperm.xlu0 %3017, %v789_v6   ;;  %v741_v29 = vmul.f32 1.442695, %v683_v18  ;;  %3021 = vpow2.f32 %v709_v23  ;;  %4566 = vst [vmem:[#allocation3_spill] sm:$0xff] %v3322_v37  ;;  %v695_v38 = vmul.f32 1.442695, %v660_v28  ;;  %v3325_v39 = vld [vmem:[%s3273_s27 + $0xc8] sm:$0xff] }
  0x1c   : > { %3023 = vpow2.f32 %v725_v26  ;;  %v711_v41 = vmul.f32 1.442695, %v668_v30  ;;  %v666_v42 = vmin.f32 %v3318_v34, 0.0  ;;  %v3330_v43 = vld [vmem:[%s3273_s27 + $0x28] sm:$0xff]  ;;  %v727_v44 = vmul.f32 1.442695, %v676_v33 }
  0x1d   : > { %3025 = vpow2.f32 %v741_v29  ;;  %v674_v45 = vmin.f32 %v3322_v37, 0.0  ;;  %v3334_v46 = vld [vmem:[%s3273_s27 + $0x68] sm:$0xff]  ;;  %v743_v47 = vmul.f32 1.442695, %v684_v36  ;;  %v682_v48 = vmin.f32 %v3325_v39, 0.0  ;;  %v3346_v55 = vld [vmem:[%s3273_s27 + $0x20] sm:$0xff] }
  0x1e   : > { %3027 = vpow2.f32 %v705_v32  ;;  %v3338_v49 = vld [vmem:[%s3273_s27 + $0xa8] sm:$0xff]  ;;  %v691_v50 = vmul.f32 1.442695, %v658_v40  ;;  %v662_v52 = vmin.f32 %v3330_v43, 0.0  ;;  %v707_v53 = vmul.f32 1.442695, %v666_v42 }
  0x1f   : > { %830 = vperm.xlu1 %3018, %v792_v7   ;;  %825 = vperm.xlu0 %3017, %v791_v8   ;;  %3029 = vpow2.f32 %v689_v35  ;;  %v3341_v51 = vld [vmem:[%s3273_s27 + $0xe8] sm:$0xff]  ;;  %v670_v54 = vmin.f32 %v3334_v46, 0.0  ;;  %v723_v56 = vmul.f32 1.442695, %v674_v45  ;;  %v678_v57 = vmin.f32 %v3338_v49, 0.0  ;;  %v3350_v58 = vld [vmem:[%s3273_s27 + $0x60] sm:$0xff] }
  0x20   : > { %3031 = vpow2.f32 %v695_v38  ;;  %v3353_v59 = vadd.f32 1.0, %v3276_v9  ;;  %v739_v60 = vmul.f32 1.442695, %v682_v48  ;;  %v686_v61 = vmin.f32 %v3341_v51, 0.0  ;;  %v3357_v62 = vld [vmem:[%s3273_s27 + $0xa0] sm:$0xff]  ;;  %v3375_v8 = vld [vmem:[%s3273_s27 + $0x38] sm:$0xff] }
  0x21   : > { %3033 = vpow2.f32 %v711_v41  ;;  %v3362_v0 = vadd.f32 1.0, %v3279_v10  ;;  %v699_v1 = vmul.f32 1.442695, %v662_v52  ;;  %v3365_v2 = vld [vmem:[%s3273_s27 + $0xe0] sm:$0xff]  ;;  %v661_v3 = vmin.f32 %v3346_v55, 0.0  ;;  %v3386_v20 = vld [vmem:[%s3273_s27 + $0x78] sm:$0xff] }
  0x22   : > { %3035 = vpow2.f32 %v727_v44  ;;  %v3371_v5 = vadd.f32 1.0, %v3282_v11  ;;  %v715_v6 = vmul.f32 1.442695, %v670_v54  ;;  %v669_v7 = vmin.f32 %v3350_v58, 0.0  ;;  %4567 = vst [vmem:[#allocation4_spill] sm:$0xff] %v3386_v20  ;;  %v3396_v28 = vld [vmem:[%s3273_s27 + $0xb8] sm:$0xff] }
  0x23   : > { %3037 = vpow2.f32 %v743_v47  ;;  %vm595_vm0 = vcmp.gt.f32.partialorder %v3276_v9, 0.0  ;;  %vm603_vm1 = vcmp.gt.f32.partialorder %v3279_v10, 0.0  ;;  %v3382_v14 = vadd.f32 1.0, %v3285_v12  ;;  %4568 = vst [vmem:[#allocation5_spill] sm:$0xff] %v3396_v28  ;;  %v3406_v35 = vld [vmem:[%s3273_s27 + $0x30] sm:$0xff] }
  0x24   : > { %v3359_v63 = vpop.eup %3019  ;;  %3039 = vpow2.f32 %v691_v50  ;;  %v731_v16 = vmul.f32 1.442695, %v678_v57  ;;  %v677_v18 = vmin.f32 %v3357_v62, 0.0  ;;  %vm611_vm2 = vcmp.gt.f32.partialorder %v3282_v11, 0.0  ;;  %4569 = vst [vmem:[#allocation6_spill] sm:$0xff] %v3406_v35  ;;  %v3416_v42 = vld [vmem:[%s3273_s27 + $0x70] sm:$0xff] }
  0x25   : > { %v3368_v4 = vpop.eup %3021  ;;  %3041 = vpow2.f32 %v707_v53  ;;  %v3392_v23 = vadd.f32 1.0, %v3290_v15  ;;  %v747_v24 = vmul.f32 1.442695, %v686_v61  ;;  %v685_v26 = vmin.f32 %v3365_v2, 0.0  ;;  %4570 = vst [vmem:[#allocation7_spill] sm:$0xff] %v3416_v42  ;;  %v3426_v50 = vld [vmem:[%s3273_s27 + $0xb0] sm:$0xff] }
  0x26   : > { %v3377_v13 = vpop.eup %3023  ;;  %3043 = vpow2.f32 %v723_v56  ;;  %vm619_vm3 = vcmp.gt.f32.partialorder %v3285_v12, 0.0  ;;  %v3402_v30 = vadd.f32 1.0, %v3294_v17  ;;  %v697_v32 = vmul.f32 1.442695, %v661_v3  ;;  %4571 = vst [vmem:[#allocation8_spill] sm:$0xff] %v3426_v50  ;;  %v3436_v57 = vld [vmem:[%s3273_s27 + $0xc0] sm:$0xff] }
  0x27   : > { %v3388_v21 = vpop.eup %3025  ;;  %3045 = vpow2.f32 %v739_v60  ;;  %v664_v33 = vmin.f32 %v3375_v8, 0.0  ;;  %v3412_v38 = vadd.f32 1.0, %v3298_v19  ;;  %v713_v40 = vmul.f32 1.442695, %v669_v7  ;;  %4572 = vst [vmem:[#allocation9_spill] sm:$0xff] %v3436_v57 }
  0x28   : > { %v3398_v29 = vpop.eup %3027  ;;  %3047 = vpow2.f32 %v699_v1  ;;  %v672_v41 = vmin.f32 %v3386_v20, 0.0  ;;  %vm593_vm5 = vcmp.gt.f32.partialorder %v3294_v17, 0.0  ;;  %v3422_v45 = vadd.f32 1.0, %v3302_v22 }
  0x29   : > { %v3408_v36 = vpop.eup %3029  ;;  %3049 = vpow2.f32 %v715_v6  ;;  %v729_v47 = vmul.f32 1.442695, %v677_v18  ;;  %v680_v48 = vmin.f32 %v3396_v28, 0.0  ;;  %vm596_vm6 = vcmp.gt.f32.partialorder %v3298_v19, 0.0  ;;  %v3446_v6 = vld [vmem:[%s3273_s27 + $0x80] sm:$0xff] }
  0x2a   : > { %v3418_v44 = vpop.eup %3031  ;;  %3051 = vpow2.f32 %v731_v16  ;;  %v3432_v53 = vadd.f32 1.0, %v3306_v25  ;;  %v745_v54 = vmul.f32 1.442695, %v685_v26  ;;  %v663_v56 = vmin.f32 %v3406_v35, 0.0  ;;  %4573 = vst [vmem:[#allocation10_spill] sm:$0xff] %v3446_v6 }
  0x2b   : > { %v3428_v52 = vpop.eup %3033  ;;  %3053 = vpow2.f32 %v747_v24  ;;  %vm604_vm7 = vcmp.gt.f32.partialorder %v3302_v22, 0.0  ;;  %v3442_v61 = vadd.f32 1.0, %v3309_v27  ;;  %v703_v1 = vmul.f32 1.442695, %v664_v33  ;;  %v3456_v24 = vld [vmem:[%s3273_s27 + $0xf0] sm:$0xff] }
  0x2c   : > { %v3438_v60 = vpop.eup %3035  ;;  %3055 = vpow2.f32 %v697_v32  ;;  %v671_v3 = vmin.f32 %v3416_v42, 0.0  ;;  %vm612_vm8 = vcmp.gt.f32.partialorder %v3306_v25, 0.0  ;;  %vm620_vm9 = vcmp.gt.f32.partialorder %v3309_v27, 0.0  ;;  %v4574_v25 = vld [vmem:[#allocation4_spill] sm:$0xff] }
  0x2d   : > { %v3448_v7 = vpop.eup %3037  ;;  %v3453_v16 = vadd.f32 1.0, %v3314_v31  ;;  %3057 = vpow2.f32 %v713_v40  ;;  %v719_v18 = vmul.f32 1.442695, %v672_v41  ;;  %v679_v26 = vmin.f32 %v3426_v50, 0.0 }
  0x2e   : > { %v3459_v32 = vpop.eup %3039  ;;  %vm594_vm10 = vcmp.gt.f32.partialorder %v3314_v31, 0.0  ;;  %v3463_v33 = vadd.f32 1.0, %v3318_v34  ;;  %3059 = vpow2.f32 %v729_v47  ;;  %v735_v42 = vmul.f32 1.442695, %v680_v48 }
  0x2f   : > { %v681_v35 = vmin.f32 %v3436_v57, 0.0  ;;  %v3466_v28 = vpop.eup %3041  ;;  %vm602_vm11 = vcmp.gt.f32.partialorder %v3318_v34, 0.0  ;;  %vm610_vm12 = vcmp.gt.f32.partialorder %v3322_v37, 0.0  ;;  %v3471_v40 = vadd.f32 1.0, %v3322_v37 }
  0x30   : > { %3061 = vpow2.f32 %v745_v54  ;;  %v701_v41 = vmul.f32 1.442695, %v663_v56  ;;  %v673_v50 = vmin.f32 %v3446_v6, 0.0  ;;  %v3044_v20 = vpop.eup %3043  ;;  %vm618_vm13 = vcmp.gt.f32.partialorder %v3325_v39, 0.0 }
  0x31   : > { %v3476_v47 = vadd.f32 1.0, %v3325_v39  ;;  %3063 = vpow2.f32 %v703_v1  ;;  %v687_v48 = vmin.f32 %v3456_v24, 0.0  ;;  %v717_v57 = vmul.f32 1.442695, %v671_v3  ;;  %v3046_v34 = vpop.eup %3045  ;;  %v4577_v3 = vld [vmem:[#allocation5_spill] sm:$0xff] }
  0x32   : > { %v3483_v37 = vsel %vm595_vm0, %v3353_v59, %v3359_v63  ;;  %v3489_v54 = vsel %vm603_vm1, %v3362_v0, %v3368_v4  ;;  %3065 = vpow2.f32 %v719_v18  ;;  %v733_v56 = vmul.f32 1.442695, %v679_v26  ;;  %v3491_v6 = vpop.eup %3047 }
  0x33   : > { %v3497_v1 = vsel %vm611_vm2, %v3371_v5, %v3377_v13  ;;  %vm598_vm14 = vcmp.gt.f32.partialorder %v3330_v43, 0.0  ;;  %vm606_vm15 = vcmp.gt.f32.partialorder %v3334_v46, 0.0  ;;  %v3502_v9 = vadd.f32 1.0, %v3330_v43  ;;  %v3504_v59 = vpop.eup %3049 }
  0x34   : > { %3067 = vpow2.f32 %v735_v42  ;;  %v737_v10 = vmul.f32 1.442695, %v681_v35  ;;  %v3510_v63 = vsel %vm619_vm3, %v3382_v14, %v3388_v21  ;;  %vm614_vm0 = vcmp.gt.f32.partialorder %v3338_v49, 0.0  ;;  %v3052_v4 = vpop.eup %3051 }
  0x35   : > { %v638_v11 = vadd.f32 1.0, %v3334_v46  ;;  %3069 = vpow2.f32 %v701_v41  ;;  %v721_v0 = vmul.f32 1.442695, %v673_v50  ;;  %v3518_v5 = vsel %vm601_vm4, %v3392_v23, %v3398_v29  ;;  %v3054_v14 = vpop.eup %3053  ;;  %v3545_v29 = vld [vmem:[%s3273_s27 + $0xf8] sm:$0xff] }
  0x36   : > { %vm622_vm1 = vcmp.gt.f32.partialorder %v3341_v51, 0.0  ;;  %v646_v12 = vadd.f32 1.0, %v3338_v49  ;;  %3071 = vpow2.f32 %v717_v57  ;;  %v749_v13 = vmul.f32 1.442695, %v687_v48  ;;  %v3530_v15 = vpop.eup %3055  ;;  %v4579_v48 = vld [vmem:[#allocation6_spill] sm:$0xff]  ;;  %v371_v49 = vld [vmem:[%s3565_s30 + $0x10] sm:$0xff] }
  0x37   : > { %v3526_v21 = vsel %vm593_vm5, %v3402_v30, %v3408_v36  ;;  %v654_v35 = vadd.f32 1.0, %v3341_v51  ;;  %vm597_vm2 = vcmp.gt.f32.partialorder %v3346_v55, 0.0  ;;  %3073 = vpow2.f32 %v733_v56  ;;  %v3547_v30 = vpop.eup %3057  ;;  %v4580_v56 = vld [vmem:[#allocation7_spill] sm:$0xff] }
  0x38   : > { %v3536_v23 = vsel %vm596_vm6, %v3412_v38, %v3418_v44  ;;  %vm605_vm3 = vcmp.gt.f32.partialorder %v3350_v58, 0.0  ;;  %vm613_vm4 = vcmp.gt.f32.partialorder %v3357_v62, 0.0  ;;  %vm621_vm5 = vcmp.gt.f32.partialorder %v3365_v2, 0.0  ;;  %v3060_v42 = vpop.eup %3059 }
  0x39   : > { %v3542_v17 = vadd.f32 1.0, %v3346_v55  ;;  %3075 = vpow2.f32 %v737_v10  ;;  %v3553_v19 = vsel %vm604_vm7, %v3422_v45, %v3428_v52  ;;  %v3556_v36 = vadd.f32 1.0, %v3350_v58  ;;  %v4581_v10 = vld [vmem:[#allocation8_spill] sm:$0xff] }
  0x3a   : > { %v3559_v38 = vadd.f32 1.0, %v3357_v62  ;;  %3077 = vpow2.f32 %v721_v0  ;;  %v3571_v22 = vsel %vm612_vm8, %v3432_v53, %v3438_v60  ;;  %v3577_v44 = vsel %vm620_vm9, %v3442_v61, %v3448_v7  ;;  %v3062_v50 = vpop.eup %3061 }
  0x3b   : > { %v653_v45 = vadd.f32 1.0, %v3365_v2  ;;  %3079 = vpow2.f32 %v749_v13  ;;  %v3584_v52 = vsel %vm594_vm10, %v3453_v16, %v3459_v32  ;;  %vm600_vm6 = vcmp.gt.f32.partialorder %v3375_v8, 0.0  ;;  %v3064_v53 = vpop.eup %3063 }
  0x3c   : > { %vm608_vm7 = vcmp.gt.f32.partialorder %v4574_v25, 0.0  ;;  %v688_v27 = vmin.f32 %v3545_v29, 0.0  ;;  %v3593_v60 = vsel %vm602_vm11, %v3463_v33, %v3466_v28  ;;  %v3598_v31 = vsel %vm610_vm12, %v3471_v40, %v3044_v20  ;;  %v3066_v16 = vpop.eup %3065  ;;  %v369_v20 = vld [vmem:[%s3565_s30] sm:$0xff]  ;;  %v370_v33 = vld [vmem:[%s3565_s30 + $0x8] sm:$0xff] }
  0x3d   : > { %vm616_vm8 = vcmp.gt.f32.partialorder %v4577_v3, 0.0  ;;  %v632_v7 = vadd.f32 1.0, %v3375_v8  ;;  %v3605_v18 = vsel %vm618_vm13, %v3476_v47, %v3046_v34  ;;  %v640_v26 = vadd.f32 1.0, %v4574_v25  ;;  %v377_v40 = vld [vmem:[%s3565_s30 + $0x40] sm:$0xff]  ;;  %v378_v34 = vld [vmem:[%s3565_s30 + $0x48] sm:$0xff] }
  0x3e   : > { %v648_v28 = vadd.f32 1.0, %v4577_v3  ;;  %v3610_v32 = vadd.f32 1.0, %v3545_v29  ;;  %v3068_v41 = vpop.eup %3067  ;;  %vm599_vm9 = vcmp.gt.f32.partialorder %v4579_v48, 0.0  ;;  %vm607_vm10 = vcmp.gt.f32.partialorder %v4580_v56, 0.0 }
  0x3f   : > { %vm615_vm11 = vcmp.gt.f32.partialorder %v4581_v10, 0.0  ;;  %v2911_v39 = vpack.c.bf16 %v370_v33, %v369_v20  ;;  %v3070_v47 = vpop.eup %3069  ;;  %vm1382_vm12 = vcmask 261120   ;;  %v3623_v0 = vsel %vm598_vm14, %v3502_v9, %v3491_v6 }
  0x40   : > { %4578 = vst [vmem:[#allocation4_spill] sm:$0xff] %v3610_v32  ;;  %v3628_v13 = vsel %vm606_vm15, %v638_v11, %v3504_v59  ;;  %v751_v57 = vmul.f32 1.442695, %v688_v27  ;;  %v2927_v61 = vpack.c.bf16 %v378_v34, %v377_v40  ;;  %v3072_v32 = vpop.eup %3071  ;;  %v3632_v20 = vsel %vm614_vm0, %v646_v12, %v3052_v4  ;;  %v4585_v27 = vld [vmem:[#allocation9_spill] sm:$0xff] }
  0x41   : > { %4582 = vst [vmem:[#allocation2_spill] sm:$0xff] %v3628_v13  ;;  %4583 = vst [vmem:[#allocation3_spill] sm:$0xff] %v3632_v20  ;;  %vm623_vm13 = vcmp.gt.f32.partialorder %v3456_v24, 0.0  ;;  %v631_v43 = vadd.f32 1.0, %v4579_v48  ;;  %v639_v6 = vadd.f32 1.0, %v4580_v56  ;;  %2912 = vmatprep.subr.bf16.mxu0 %v2911_v39  ;;  %v3074_v9 = vpop.eup %3073  ;;  %v3639_v46 = vsel %vm622_vm1, %v654_v35, %v3054_v14  ;;  %v372_v4 = vld [vmem:[%s3565_s30 + $0x18] sm:$0xff] }
  0x42   : > { %4584 = vst [vmem:[#allocation5_spill] sm:$0xff] %v3639_v46  ;;  %v647_v59 = vadd.f32 1.0, %v4581_v10  ;;  %v655_v11 = vadd.f32 1.0, %v3456_v24  ;;  %vm617_vm14 = vcmp.gt.f32.partialorder %v4585_v27, 0.0  ;;  %2928 = vmatprep.subr.bf16.mxu1 %v2927_v61  ;;  %2914 = vmatpush3.bf16.msra.mxu0 %v2911_v39  ;;  %v757_v51 = vsel %vm597_vm2, %v3542_v17, %v3530_v15  ;;  %v4586_v35 = vld [vmem:[#allocation10_spill] sm:$0xff] }
  0x43   : > { %v3076_v12 = vpop.eup %3075  ;;  %v649_v14 = vadd.f32 1.0, %v4585_v27  ;;  %v641_v34 = vadd.f32 1.0, %v4586_v35  ;;  %2930 = vmatpush3.bf16.msra.mxu1 %v2927_v61  ;;  %v2915_v46 = vpack.c.bf16 %v372_v4, %v371_v49  ;;  %v765_v39 = vsel %vm605_vm3, %v3556_v36, %v3547_v30 }
  0x44   : > { %v3078_v20 = vpop.eup %3077  ;;  %v3659_v13 = vsel %vm613_vm4, %v3559_v38, %v3060_v42  ;;  %v3663_v55 = vsel %vm621_vm5, %v653_v45, %v3062_v50  ;;  %vm609_vm15 = vcmp.gt.f32.partialorder %v4586_v35, 0.0  ;;  %v3670_v58 = vsel %vm600_vm6, %v632_v7, %v3064_v53 }
  0x45   : > { %v3080_v15 = vpop.eup %3079  ;;  %v3674_v62 = vsel %vm608_vm7, %v640_v26, %v3066_v16  ;;  %2916 = vmatprep.subr.bf16.mxu0 %v2915_v46  ;;  %v3680_v36 = vsel %vm616_vm8, %v648_v28, %v3068_v41  ;;  %3081 = vpow2.f32 %v751_v57  ;;  %v767_v38 = vsel %vm607_vm10, %v639_v6, %v3072_v32 }
  0x46   : > { %2918 = vmatpush3.bf16.msra.mxu0 %v2915_v46  ;;  %v3700_v50 = vsel %vm615_vm11, %v647_v59, %v3074_v9  ;;  %v3704_v25 = vsel %vm623_vm13, %v655_v11, %v3080_v15  ;;  %vm624_vm0 = vcmp.gt.f32.partialorder %v3545_v29, 0.0 }
  0x48   : > { %v4587_v4 = vld [vmem:[#allocation2_spill] sm:$0xff] }
  0x92   : > { %v806_v33 = vpop.permute.xlu1 %805  ;;  %v796_v40 = vpop.permute.xlu0 %795 }
  0x93   : > { %v841_v17 = vmul.f32 %v796_v40, %v3518_v5  ;;  %v833_v61 = vmul.f32 %v796_v40, %v3526_v21  ;;  %v835_v2 = vmul.f32 %v806_v33, %v3483_v37  ;;  %v843_v30 = vmul.f32 %v806_v33, %v3489_v54 }
  0x94   : > { %v3684_v5 = vsel %vm599_vm9, %v631_v43, %v3070_v47  ;;  %v777_v37 = vsel %vm617_vm14, %v649_v14, %v3076_v12  ;;  %v769_v54 = vsel %vm609_vm15, %v641_v34, %v3078_v20  ;;  %v3693_v42 = vmul.f32 %v806_v33, %v3497_v1 }
  0x95   : > { %995 = vxpose.xlu1.b32.start [1/8] (short) (narrow) %v841_v17, 32  ;;  %865 = vxpose.xlu0.b32.start [1/8] (short) (narrow) %v833_v61, 32  ;;  %v3696_v45 = vmul.f32 %v806_v33, %v3510_v63  ;;  %v1902_v16 = vsel %vm1382_vm12, %v835_v2, 0.0  ;;  %v1923_v63 = vsel %vm1382_vm12, %v843_v30, 0.0  ;;  %v3712_v26 = vmul.f32 %v796_v40, %v777_v37 }
  0x96   : > { %v811_v8 = vpop.permute.xlu1 %810  ;;  %v801_v21 = vpop.permute.xlu0 %800  ;;  %v3714_v28 = vmul.f32 %v796_v40, %v769_v54  ;;  %v1920_v24 = vsel %vm1382_vm12, %v841_v17, 0.0  ;;  %v1899_v32 = vsel %vm1382_vm12, %v833_v61, 0.0  ;;  %v3724_v41 = vsel %vm1382_vm12, %v3693_v42, 0.0 }
  0x97   : > { %v836_v53 = vmul.f32 %v811_v8, %v3536_v23  ;;  %v844_v3 = vmul.f32 %v811_v8, %v3553_v19  ;;  %v834_v7 = vmul.f32 %v801_v21, %v3584_v52  ;;  %v842_v1 = vmul.f32 %v801_v21, %v3593_v60 }
  0x98   : > { %v3727_v48 = vmul.f32 %v811_v8, %v3571_v22  ;;  %v3732_v6 = vmul.f32 %v811_v8, %v3577_v44  ;;  %v3735_v9 = vmul.f32 %v801_v21, %v3598_v31  ;;  %v1965_v22 = vsel %vm1382_vm12, %v3696_v45, 0.0 }
  0x99   : > { %v1900_v23 = vsel %vm1382_vm12, %v834_v7, 0.0  ;;  %v1921_v19 = vsel %vm1382_vm12, %v842_v1, 0.0  ;;  %996 = vxpose.xlu1.b32.cont [2/8] (short) (narrow) %v842_v1, 32  ;;  %866 = vxpose.xlu0.b32.cont [2/8] (short) (narrow) %v834_v7, 32  ;;  %v1904_v47 = vsel %vm1382_vm12, %v836_v53, 0.0  ;;  %v1925_v57 = vsel %vm1382_vm12, %v844_v3, 0.0 }
  0x9a   : > { %v3720_v52 = vpop.permute.xlu1 %820  ;;  %v816_v60 = vpop.permute.xlu0 %815  ;;  %v1901_v56 = vadd.f32 %v1900_v23, %v1899_v32  ;;  %v1922_v10 = vadd.f32 %v1921_v19, %v1920_v24  ;;  %v3740_v11 = vmul.f32 %v801_v21, %v3605_v18  ;;  %v1962_v44 = vsel %vm1382_vm12, %v3712_v26, 0.0  ;;  %v4588_v21 = vld [vmem:[#allocation3_spill] sm:$0xff]  ;;  %v380_v7 = vld [vmem:[%s3565_s30 + $0x58] sm:$0xff]  ;;  %v373_v1 = vld [vmem:[%s3565_s30 + $0x20] sm:$0xff] }
  0x9b   : > { %v837_v20 = vmul.f32 %v816_v60, %v757_v51  ;;  %v845_v43 = vmul.f32 %v816_v60, %v765_v39  ;;  %v1941_v31 = vsel %vm1382_vm12, %v3714_v28, 0.0  ;;  %v3751_v49 = vmul.f32 %v3720_v52, %v3623_v0  ;;  %v3082_v51 = vpop.eup %3081  ;;  %v374_v24 = vld [vmem:[%s3565_s30 + $0x28] sm:$0xff]  ;;  %v381_v32 = vld [vmem:[%s3565_s30 + $0x60] sm:$0xff] }
  0x9c   : > { %v1903_v46 = vadd.f32 %v1902_v16, %v1901_v56  ;;  %v1924_v59 = vadd.f32 %v1923_v63, %v1922_v10  ;;  %v3755_v18 = vmul.f32 %v3720_v52, %v4587_v4  ;;  %v1946_v14 = vsel %vm1382_vm12, %v3727_v48, 0.0  ;;  %v382_v23 = vld [vmem:[%s3565_s30 + $0x68] sm:$0xff] }
  0x9d   : > { %997 = vxpose.xlu1.b32.cont [3/8] (short) (narrow) %v843_v30, 32  ;;  %867 = vxpose.xlu0.b32.cont [3/8] (short) (narrow) %v835_v2, 32  ;;  %v1906_v35 = vsel %vm1382_vm12, %v837_v20, 0.0  ;;  %v1927_v34 = vsel %vm1382_vm12, %v845_v43, 0.0  ;;  %v1967_v39 = vsel %vm1382_vm12, %v3732_v6, 0.0  ;;  %v1942_v15 = vsel %vm1382_vm12, %v3735_v9, 0.0 }
  0x9e   : > { %v3742_v27 = vpop.permute.xlu1 %830  ;;  %v1905_v12 = vadd.f32 %v1904_v47, %v1903_v46  ;;  %v1926_v33 = vadd.f32 %v1925_v57, %v1924_v59  ;;  %v3757_v40 = vpop.permute.xlu0 %825  ;;  %v1963_v2 = vsel %vm1382_vm12, %v3740_v11, 0.0  ;;  %v3786_v37 = vmul.f32 %v3720_v52, %v4588_v21  ;;  %v375_v47 = vld [vmem:[%s3565_s30 + $0x30] sm:$0xff]  ;;  %v376_v57 = vld [vmem:[%s3565_s30 + $0x38] sm:$0xff]  ;;  %v385_v21 = vld [vmem:[%s3565_s30 + $0x80] sm:$0xff] }
  0x9f   : > { %v3765_v0 = vmul.f32 %v3742_v27, %v3670_v58  ;;  %v3775_v30 = vmul.f32 %v3742_v27, %v3674_v62  ;;  %v3779_v58 = vmul.f32 %v3757_v40, %v3684_v5  ;;  %v3782_v8 = vmul.f32 %v3757_v40, %v767_v38  ;;  %v379_v38 = vld [vmem:[%s3565_s30 + $0x50] sm:$0xff] }
  0xa0   : > { %v1907_v17 = vadd.f32 %v1906_v35, %v1905_v12  ;;  %v1928_v61 = vadd.f32 %v1927_v34, %v1926_v33  ;;  %v1908_v62 = vsel %vm1382_vm12, %v3751_v49, 0.0  ;;  %v1929_v54 = vsel %vm1382_vm12, %v3755_v18, 0.0 }
  0xa1   : > { %998 = vxpose.xlu1.b32.cont [4/8] (short) (narrow) %v844_v3, 32  ;;  %868 = vxpose.xlu0.b32.cont [4/8] (short) (narrow) %v836_v53, 32  ;;  %v3793_v5 = vmul.f32 %v816_v60, %v3659_v13  ;;  %v3799_v53 = vmul.f32 %v816_v60, %v3663_v55  ;;  %v1912_v3 = vsel %vm1382_vm12, %v3765_v0, 0.0  ;;  %v1910_v19 = vsel %vm1382_vm12, %v3779_v58, 0.0 }
  0xa2   : > { %v1909_v16 = vadd.f32 %v1908_v62, %v1907_v17  ;;  %v1930_v63 = vadd.f32 %v1929_v54, %v1928_v61  ;;  %v1931_v13 = vsel %vm1382_vm12, %v3782_v8, 0.0  ;;  %v1964_v56 = vadd.f32 %v1963_v2, %v1962_v44  ;;  %v4590_v61 = vld [vmem:[#allocation4_spill] sm:$0xff]  ;;  %v386_v62 = vld [vmem:[%s3565_s30 + $0x88] sm:$0xff] }
  0xa3   : > { %v1943_v10 = vadd.f32 %v1942_v15, %v1941_v31  ;;  %v1933_v55 = vsel %vm1382_vm12, %v3775_v30, 0.0  ;;  %v2931_v59 = vpack.c.bf16 %v380_v7, %v379_v38  ;;  %v2919_v33 = vpack.c.bf16 %v374_v24, %v373_v1  ;;  %v4589_v31 = vld [vmem:[#allocation5_spill] sm:$0xff] }
  0xa4   : > { %v1911_v60 = vadd.f32 %v1910_v19, %v1909_v16  ;;  %v1932_v46 = vadd.f32 %v1931_v13, %v1930_v63  ;;  %v1966_v4 = vadd.f32 %v1965_v22, %v1964_v56  ;;  %v2935_v44 = vpack.c.bf16 %v382_v23, %v381_v32 }
  0xa5   : > { %999 = vxpose.xlu1.b32.cont [5/8] (short) (narrow) %v845_v43, 32  ;;  %869 = vxpose.xlu0.b32.cont [5/8] (short) (narrow) %v837_v20, 32  ;;  %v1945_v12 = vadd.f32 %v3724_v41, %v1943_v10  ;;  %v3817_v35 = vmul.f32 %v3720_v52, %v4589_v31  ;;  %v2923_v17 = vpack.c.bf16 %v376_v57, %v375_v47  ;;  %v383_v43 = vld [vmem:[%s3565_s30 + $0x70] sm:$0xff]  ;;  %v384_v20 = vld [vmem:[%s3565_s30 + $0x78] sm:$0xff]  ;;  %v1948_v52 = vsel %vm1382_vm12, %v3793_v5, 0.0 }
  0xa6   : > { %v3819_v34 = vadd.f32 %v1912_v3, %v1911_v60  ;;  %v3821_v15 = vadd.f32 %v1933_v55, %v1932_v46  ;;  %2932 = vmatprep.subr.bf16.mxu1 %v2931_v59  ;;  %v784_v22 = vsel %vm624_vm0, %v4590_v61, %v3082_v51  ;;  %v1968_v41 = vadd.f32 %v1967_v39, %v1966_v4  ;;  %v3908_v55 = vld [vmem:[%s3883_s8 + $0x18] sm:$0xff]  ;;  %v3913_v4 = vld [vmem:[%s3883_s8 + $0x50] sm:$0xff] }
  0xa7   : > { %v1947_v2 = vadd.f32 %v1946_v14, %v1945_v12  ;;  %2934 = vmatpush3.bf16.msra.mxu1 %v2931_v59  ;;  %2920 = vmatprep.subr.bf16.mxu0 %v2919_v33  ;;  %v1969_v54 = vsel %vm1382_vm12, %v3799_v53, 0.0  ;;  %v855_v38 = vmul.f32 %v3757_v40, %v3700_v50  ;;  %v863_v29 = vmul.f32 %v3757_v40, %v3704_v25  ;;  %v394_v40 = vld [vmem:[%s3565_s30 + $0xc8] sm:$0xff] }
  0xa8   : > { %v1950_v51 = vsel %vm1382_vm12, %v3786_v37, 0.0  ;;  %v1970_v14 = vadd.f32 %v1969_v54, %v1968_v41  ;;  %2936 = vmatprep.subr.bf16.mxu1 %v2935_v44  ;;  %2922 = vmatpush3.bf16.msra.mxu0 %v2919_v33  ;;  %v2939_v7 = vpack.c.bf16 %v384_v20, %v383_v43  ;;  %v1971_v1 = vsel %vm1382_vm12, %v3817_v35, 0.0  ;;  %v3922_v43 = vld [vmem:[%s3883_s8 + $0x60] sm:$0xff] }
  0xa9   : > { %1000 = vxpose.xlu1.b32.cont [6/8] (short) (narrow) %v3755_v18, 32  ;;  %870 = vxpose.xlu0.b32.cont [6/8] (short) (narrow) %v3751_v49, 32  ;;  %v1949_v39 = vadd.f32 %v1948_v52, %v1947_v2  ;;  %v856_v50 = vmul.f32 %v3742_v27, %v3680_v36  ;;  %v864_v25 = vmul.f32 %v3742_v27, %v784_v22  ;;  %v393_v49 = vld [vmem:[%s3565_s30 + $0xc0] sm:$0xff]  ;;  %v1952_v63 = vsel %vm1382_vm12, %v855_v38, 0.0 }
  0xaa   : > { %2924 = vmatprep.subr.bf16.mxu0 %v2923_v17  ;;  %v3847_v18 = vpack.c.bf16 %v386_v62, %v385_v21  ;;  %v1972_v3 = vadd.f32 %v1971_v1, %v1970_v14  ;;  %v1973_v24 = vsel %vm1382_vm12, %v863_v29, 0.0  ;;  %v3855_v27 = vpack.c.bf16 %v394_v40, %v393_v49  ;;  %v3947_v40 = vld [vmem:[%s3883_s8 + $0x48] sm:$0xff] }
  0xab   : > { %v1951_v16 = vadd.f32 %v1950_v51, %v1949_v39  ;;  %2938 = vmatpush3.bf16.msra.mxu1 %v2935_v44  ;;  %v1954_v23 = vsel %vm1382_vm12, %v856_v50, 0.0  ;;  %v1975_v19 = vsel %vm1382_vm12, %v864_v25, 0.0  ;;  %v1935_v46 = vrot.slane %v3821_v15, 4  ;;  %v3917_v44 = vld [vmem:[%s3883_s8 + $0x28] sm:$0xff] }
  0xac   : > { %v1974_v32 = vadd.f32 %v1973_v24, %v1972_v3  ;;  %2940 = vmatprep.subr.bf16.mxu1 %v2939_v7  ;;  %2926 = vmatpush3.bf16.msra.mxu0 %v2923_v17  ;;  %v468_v33 = vmin.f32 %v3908_v55, 0.0  ;;  %v475_v17 = vmin.f32 %v3913_v4, 0.0  ;;  %v470_v41 = vmin.f32 %v3917_v44, 0.0  ;;  %v3953_v24 = vld [vmem:[%s3883_s8 + $0x80] sm:$0xff] }
  0xad   : > { %1001 = vxpose.xlu1.b32.cont [7/8] (short) (narrow) %v3782_v8, 32  ;;  %871 = vxpose.xlu0.b32.cont [7/8] (short) (narrow) %v3779_v58, 32  ;;  %v1953_v36 = vadd.f32 %v1952_v63, %v1951_v16  ;;  %v3901_v8 = vld [vmem:[%s3883_s8 + $0x10] sm:$0xff]  ;;  %v477_v21 = vmin.f32 %v3922_v43, 0.0  ;;  %vm404_vm7 = vcmp.gt.f32.partialorder %v3908_v55, 0.0  ;;  %vm411_vm8 = vcmp.gt.f32.partialorder %v3913_v4, 0.0 }
  0xae   : > { %2944 = vmatprep.subr.bf16.mxu0 %v3847_v18  ;;  %v3860_v13 = vadd.f32 %v1975_v19, %v1974_v32  ;;  %v467_v47 = vmin.f32 %v3901_v8, 0.0  ;;  %v503_v22 = vmul.f32 1.442695, %v468_v33  ;;  %v517_v54 = vmul.f32 1.442695, %v475_v17  ;;  %v3996_v33 = vld [vmem:[%s3883_s8 + $0x68] sm:$0xff] }
  0xaf   : > { %v3862_v56 = vadd.f32 %v1954_v23, %v1953_v36  ;;  %2942 = vmatpush3.bf16.msra.mxu1 %v2939_v7  ;;  %v507_v7 = vmul.f32 1.442695, %v470_v41  ;;  %vm403_vm5 = vcmp.gt.f32.partialorder %v3901_v8, 0.0  ;;  %v436_v19 = vadd.f32 1.0, %v3908_v55 }
  0xb0   : > { %2960 = vmatprep.subr.bf16.mxu1 %v3855_v27  ;;  %v501_v12 = vmul.f32 1.442695, %v467_v47  ;;  %v3980_v47 = vld [vmem:[%s3883_s8 + $0x90] sm:$0xff]  ;;  %vm406_vm9 = vcmp.gt.f32.partialorder %v3917_v44, 0.0  ;;  %vm413_vm10 = vcmp.gt.f32.partialorder %v3922_v43, 0.0  ;;  %vm410_vm14 = vcmp.gt.f32.partialorder %v3947_v40, 0.0 }
  0xb1   : > { %1002 = vxpose.xlu1.b32.end [8/8] (short) (narrow) %v3775_v30, 32  ;;  %872 = vxpose.xlu0.b32.end [8/8] (short) (narrow) %v3765_v0, 32  ;;  %v3896_v0 = vld [vmem:[%s3883_s8 + $0x30] sm:$0xff]  ;;  %vm417_vm15 = vcmp.gt.f32.partialorder %v3953_v24, 0.0 }
  0xb2   : > { %v471_v58 = vmin.f32 %v3896_v0, 0.0  ;;  %vm407_vm4 = vcmp.gt.f32.partialorder %v3896_v0, 0.0  ;;  %v439_v39 = vadd.f32 1.0, %v3896_v0 }
  0xb4   : > { %v509_v57 = vmul.f32 1.442695, %v471_v58 }
  0xb5   : > { %1253 = vxpose.xlu1.b32.start [1/8] (short) (narrow) %v3712_v26, 32  ;;  %1124 = vxpose.xlu0.b32.start [1/8] (short) (narrow) %v3714_v28, 32  ;;  %v3888_v28 = vld [vmem:[%s3883_s8 + $0x20] sm:$0xff] }
  0xb6   : > { %vm405_vm2 = vcmp.gt.f32.partialorder %v3888_v28, 0.0  ;;  %v437_v2 = vadd.f32 1.0, %v3888_v28 }
  0xb9   : > { %1254 = vxpose.xlu1.b32.cont [2/8] (short) (narrow) %v3740_v11, 32  ;;  %1125 = vxpose.xlu0.b32.cont [2/8] (short) (narrow) %v3735_v9, 32  ;;  %v469_v11 = vmin.f32 %v3888_v28, 0.0 }
  0xbd   : > { %1255 = vxpose.xlu1.b32.cont [3/8] (short) (narrow) %v3696_v45, 32  ;;  %1126 = vxpose.xlu0.b32.cont [3/8] (short) (narrow) %v3693_v42, 32  ;;  %v306_v42 = vld [vmem:[%s3883_s8 + $0x8] sm:$0xff]  ;;  %v1914_v45 = vrot.slane %v3819_v34, 4 }
  0xbe   : > { %v466_v26 = vmin.f32 %v306_v42, 0.0  ;;  %v434_v20 = vadd.f32 1.0, %v306_v42  ;;  %vm402_vm1 = vcmp.gt.f32.partialorder %v306_v42, 0.0  ;;  %v3964_v42 = vadd.f32 1.0, %v3913_v4 }
  0xc0   : > { %v499_v9 = vmul.f32 1.442695, %v466_v26  ;;  %v474_v26 = vmin.f32 %v3947_v40, 0.0 }
  0xc1   : > { %1256 = vxpose.xlu1.b32.cont [4/8] (short) (narrow) %v3732_v6, 32  ;;  %1127 = vxpose.xlu0.b32.cont [4/8] (short) (narrow) %v3727_v48, 32  ;;  %v3891_v48 = vld [vmem:[%s3883_s8] sm:$0xff]  ;;  %v1915_v6 = vadd.f32 %v1914_v45, %v3819_v34 }
  0xc2   : > { %v465_v30 = vmin.f32 %v3891_v48, 0.0  ;;  %3083 = vpow2.f32 %v499_v9  ;;  %vm401_vm3 = vcmp.gt.f32.partialorder %v3891_v48, 0.0  ;;  %v433_v51 = vadd.f32 1.0, %v3891_v48 }
  0xc3   : > { %v481_v9 = vmin.f32 %v3953_v24, 0.0 }
  0xc4   : > { %v497_v10 = vmul.f32 1.442695, %v465_v30 }
  0xc5   : > { %1257 = vxpose.xlu1.b32.cont [5/8] (short) (narrow) %v3799_v53, 32  ;;  %1128 = vxpose.xlu0.b32.cont [5/8] (short) (narrow) %v3793_v5, 32  ;;  %v505_v5 = vmul.f32 1.442695, %v469_v11  ;;  %v3904_v53 = vld [vmem:[%s3883_s8 + $0x40] sm:$0xff]  ;;  %v3973_v11 = vld [vmem:[%s3883_s8 + $0x58] sm:$0xff] }
  0xc6   : > { %v473_v59 = vmin.f32 %v3904_v53, 0.0  ;;  %vm409_vm6 = vcmp.gt.f32.partialorder %v3904_v53, 0.0  ;;  %v441_v23 = vadd.f32 1.0, %v3904_v53  ;;  %v476_v0 = vmin.f32 %v3973_v11, 0.0 }
  0xc7   : > { %3085 = vpow2.f32 %v505_v5  ;;  %vm412_vm0 = vcmp.gt.f32.partialorder %v3973_v11, 0.0 }
  0xc8   : > { %3087 = vpow2.f32 %v497_v10  ;;  %v513_v34 = vmul.f32 1.442695, %v473_v59  ;;  %v519_v53 = vmul.f32 1.442695, %v476_v0 }
  0xc9   : > { %1258 = vxpose.xlu1.b32.cont [6/8] (short) (narrow) %v3817_v35, 32  ;;  %1129 = vxpose.xlu0.b32.cont [6/8] (short) (narrow) %v3786_v37, 32  ;;  %v1916_v37 = vrot.slane %v1915_v6, 2  ;;  %3089 = vpow2.f32 %v509_v57  ;;  %v1936_v35 = vadd.f32 %v1935_v46, %v3821_v15  ;;  %v3929_v15 = vld [vmem:[%s3883_s8 + $0x38] sm:$0xff]  ;;  %v438_v57 = vadd.f32 1.0, %v3917_v44 }
  0xca   : > { %3091 = vpow2.f32 %v501_v12  ;;  %v472_v1 = vmin.f32 %v3929_v15, 0.0  ;;  %v515_v12 = vmul.f32 1.442695, %v474_v26  ;;  %vm408_vm11 = vcmp.gt.f32.partialorder %v3929_v15, 0.0 }
  0xcb   : > { %v1917_v60 = vadd.f32 %v1916_v37, %v1915_v6  ;;  %v1937_v52 = vrot.slane %v1936_v35, 2  ;;  %3093 = vpow2.f32 %v513_v34  ;;  %v1956_v37 = vrot.slane %v3862_v56, 4 }
  0xcc   : > { %v3084_v61 = vpop.eup %3083  ;;  %3095 = vpow2.f32 %v503_v22  ;;  %v511_v45 = vmul.f32 1.442695, %v472_v1  ;;  %v483_v34 = vmin.f32 %v3980_v47, 0.0  ;;  %v4030_v1 = vld [vmem:[%s3883_s8 + $0x78] sm:$0xff] }
  0xcd   : > { %1259 = vxpose.xlu1.b32.cont [7/8] (short) (narrow) %v863_v29, 32  ;;  %1130 = vxpose.xlu0.b32.cont [7/8] (short) (narrow) %v855_v38, 32  ;;  %v1918_v31 = vrot.slane %v1917_v60, 1  ;;  %v3934_v38 = vld [vmem:[%s3883_s8 + $0x70] sm:$0xff]  ;;  %v3936_v29 = vsel %vm402_vm1, %v434_v20, %v3084_v61  ;;  %v1938_v16 = vadd.f32 %v1937_v52, %v1936_v35  ;;  %3097 = vpow2.f32 %v517_v54 }
  0xce   : > { %v479_v49 = vmin.f32 %v3934_v38, 0.0  ;;  %3099 = vpow2.f32 %v507_v7  ;;  %v529_v35 = vmul.f32 1.442695, %v481_v9  ;;  %v1957_v61 = vadd.f32 %v1956_v37, %v3862_v56 }
  0xcf   : > { %v3931_v62 = vadd.f32 %v1918_v31, %v1917_v60  ;;  %v1939_v58 = vrot.slane %v1938_v16, 1  ;;  %v3989_v60 = vadd.f32 1.0, %v3922_v43  ;;  %v478_v52 = vmin.f32 %v3996_v33, 0.0 }
  0xd0   : > { %v525_v6 = vmul.f32 1.442695, %v479_v49  ;;  %vm415_vm13 = vcmp.gt.f32.partialorder %v3934_v38, 0.0  ;;  %vm419_vm1 = vcmp.gt.f32.partialorder %v3980_v47, 0.0 }
  0xd1   : > { %1260 = vxpose.xlu1.b32.end [8/8] (short) (narrow) %v864_v25, 32  ;;  %1131 = vxpose.xlu0.b32.end [8/8] (short) (narrow) %v856_v50, 32  ;;  %v3086_v14 = vpop.eup %3085  ;;  %v435_v50 = vadd.f32 1.0, %v3901_v8  ;;  %v521_v25 = vmul.f32 1.442695, %v477_v21  ;;  %v1984_v63 = vmul.f32 %v3931_v62, %v3936_v29  ;;  %v4003_v20 = vadd.f32 %v1939_v58, %v1938_v16  ;;  %v4057_v58 = vld [vmem:[%s3883_s8 + $0x88] sm:$0xff] }
  0xd2   : > { %v3088_v3 = vpop.eup %3087  ;;  %v3957_v36 = vsel %vm405_vm2, %v437_v2, %v3086_v14  ;;  %v4010_v2 = vld [vmem:[%s3883_s8 + $0xa0] sm:$0xff]  ;;  %v440_v21 = vadd.f32 1.0, %v3929_v15  ;;  %v533_v16 = vmul.f32 1.442695, %v483_v34  ;;  %vm414_vm2 = vcmp.gt.f32.partialorder %v3996_v33, 0.0 }
  0xd3   : > { %v3090_v32 = vpop.eup %3089  ;;  %v3969_v28 = vsel %vm401_vm3, %v433_v51, %v3088_v3  ;;  %3101 = vpow2.f32 %v521_v25  ;;  %v2018_v5 = vsel %vm1382_vm12, %v1984_v63, 0.0  ;;  %v1987_v10 = vmul.f32 %v3931_v62, %v3957_v36  ;;  %v4036_v63 = vld [vmem:[%s3883_s8 + $0xb0] sm:$0xff] }
  0xd4   : > { %v3092_v30 = vpop.eup %3091  ;;  %v3984_v48 = vsel %vm407_vm4, %v439_v39, %v3090_v32  ;;  %v1983_v59 = vmul.f32 %v3931_v62, %v3969_v28  ;;  %3103 = vpow2.f32 %v511_v45  ;;  %v447_v39 = vadd.f32 1.0, %v3934_v38 }
  0xd5   : > { %v3094_v46 = vpop.eup %3093  ;;  %v4000_v31 = vsel %vm403_vm5, %v435_v50, %v3092_v30  ;;  %3105 = vpow2.f32 %v525_v6  ;;  %v2027_v22 = vsel %vm1382_vm12, %v1987_v10, 0.0  ;;  %v1989_v41 = vmul.f32 %v3931_v62, %v3984_v48 }
  0xd6   : > { %v3096_v17 = vpop.eup %3095  ;;  %v4014_v8 = vsel %vm409_vm6, %v441_v23, %v3094_v46  ;;  %v2015_v54 = vsel %vm1382_vm12, %v1983_v59, 0.0  ;;  %v1985_v51 = vmul.f32 %v3931_v62, %v4000_v31  ;;  %3107 = vpow2.f32 %v515_v12  ;;  %v4063_v59 = vld [vmem:[%s3883_s8 + $0xc0] sm:$0xff] }
  0xd7   : > { %v3098_v56 = vpop.eup %3097  ;;  %v4025_v14 = vsel %vm404_vm7, %v436_v19, %v3096_v17  ;;  %3109 = vpow2.f32 %v529_v35  ;;  %v485_v7 = vmin.f32 %v4010_v2, 0.0  ;;  %v1958_v25 = vrot.slane %v1957_v61, 2 }
  0xd8   : > { %v3100_v50 = vpop.eup %3099  ;;  %v2033_v49 = vsel %vm1382_vm12, %v1989_v41, 0.0  ;;  %v1991_v3 = vmul.f32 %v4003_v20, %v4014_v8  ;;  %v4041_v32 = vsel %vm411_vm8, %v3964_v42, %v3098_v56  ;;  %v442_v23 = vadd.f32 1.0, %v3947_v40 }
  0xd9   : > { %v523_v19 = vmul.f32 1.442695, %v478_v52  ;;  %v2021_v45 = vsel %vm1382_vm12, %v1985_v51, 0.0  ;;  %v1986_v26 = vmul.f32 %v3931_v62, %v4025_v14  ;;  %3111 = vpow2.f32 %v519_v53  ;;  %v4090_v53 = vld [vmem:[%s3883_s8 + $0xd0] sm:$0xff] }
  0xda   : > { %v480_v6 = vmin.f32 %v4030_v1, 0.0  ;;  %v4052_v4 = vsel %vm406_vm9, %v438_v57, %v3100_v50  ;;  %v449_v42 = vadd.f32 1.0, %v3953_v24  ;;  %v537_v9 = vmul.f32 1.442695, %v485_v7 }
  0xdb   : > { %v487_v30 = vmin.f32 %v4036_v63, 0.0  ;;  %v2039_v10 = vsel %vm1382_vm12, %v1991_v3, 0.0  ;;  %v1993_v46 = vmul.f32 %v4003_v20, %v4041_v32  ;;  %3113 = vpow2.f32 %v533_v16 }
  0xdc   : > { %v444_v12 = vadd.f32 1.0, %v3973_v11  ;;  %3115 = vpow2.f32 %v523_v19  ;;  %v2024_v0 = vsel %vm1382_vm12, %v1986_v26, 0.0  ;;  %v1988_v35 = vmul.f32 %v3931_v62, %v4052_v4 }
  0xdd   : > { %v3102_v55 = vpop.eup %3101  ;;  %v527_v34 = vmul.f32 1.442695, %v480_v6  ;;  %v482_v17 = vmin.f32 %v4057_v58, 0.0  ;;  %3117 = vpow2.f32 %v537_v9  ;;  %v1977_v52 = vrot.slane %v3860_v13, 4  ;;  %v4117_v9 = vld [vmem:[%s3883_s8 + $0xe0] sm:$0xff] }
  0xde   : > { %v3104_v37 = vpop.eup %3103  ;;  %v4068_v57 = vsel %vm413_vm10, %v3989_v60, %v3102_v55  ;;  %v541_v60 = vmul.f32 1.442695, %v487_v30  ;;  %v491_v16 = vmin.f32 %v4090_v53, 0.0  ;;  %v4108_v55 = vld [vmem:[%s3883_s8 + $0xa8] sm:$0xff]  ;;  %vm421_vm3 = vcmp.gt.f32.partialorder %v4010_v2, 0.0 }
  0xdf   : > { %v3106_v44 = vpop.eup %3105  ;;  %v4082_v43 = vsel %vm408_vm11, %v440_v21, %v3104_v37  ;;  %v1995_v51 = vmul.f32 %v4003_v20, %v4068_v57  ;;  %v451_v21 = vadd.f32 1.0, %v3980_v47  ;;  %3119 = vpow2.f32 %v527_v34 }
  0xe0   : > { %v3108_v41 = vpop.eup %3107  ;;  %v4094_v15 = vsel %vm415_vm13, %v447_v39, %v3106_v44  ;;  %v531_v3 = vmul.f32 1.442695, %v482_v17  ;;  %3121 = vpow2.f32 %v541_v60  ;;  %v549_v44 = vmul.f32 1.442695, %v491_v16  ;;  %v4139_v60 = vld [vmem:[%s3883_s8 + $0xb8] sm:$0xff] }
  0xe1   : > { %v3110_v7 = vpop.eup %3109  ;;  %v4104_v38 = vsel %vm410_vm14, %v442_v23, %v3108_v41  ;;  %v1997_v6 = vmul.f32 %v4003_v20, %v4094_v15  ;;  %v446_v23 = vadd.f32 1.0, %v3996_v33  ;;  %vm416_vm4 = vcmp.gt.f32.partialorder %v4030_v1, 0.0  ;;  %v4163_v33 = vld [vmem:[%s3883_s8 + $0xc8] sm:$0xff] }
  0xe2   : > { %v4121_v40 = vsel %vm417_vm15, %v449_v42, %v3110_v7  ;;  %3123 = vpow2.f32 %v531_v3  ;;  %v453_v42 = vadd.f32 1.0, %v4010_v2  ;;  %v488_v7 = vmin.f32 %v4139_v60, 0.0 }
  0xe3   : > { %v3112_v19 = vpop.eup %3111  ;;  %v2057_v34 = vsel %vm1382_vm12, %v1997_v6, 0.0  ;;  %vm897_vm5 = vcmask 523264   ;;  %vm423_vm6 = vcmp.gt.f32.partialorder %v4036_v63, 0.0  ;;  %vm418_vm7 = vcmp.gt.f32.partialorder %v4057_v58, 0.0 }
  0xe4   : > { %v4131_v24 = vsel %vm412_vm0, %v444_v12, %v3112_v19  ;;  %v448_v12 = vadd.f32 1.0, %v4030_v1  ;;  %v455_v19 = vadd.f32 1.0, %v4036_v63  ;;  %v450_v2 = vadd.f32 1.0, %v4057_v58 }
  0xe5   : > { %vm425_vm8 = vcmp.gt.f32.partialorder %v4063_v59, 0.0  ;;  %vm427_vm10 = vcmp.gt.f32.partialorder %v4090_v53, 0.0  ;;  %vm422_vm11 = vcmp.gt.f32.partialorder %v4108_v55, 0.0  ;;  %vm429_vm13 = vcmp.gt.f32.partialorder %v4117_v9, 0.0 }
  0xe6   : > { %vm424_vm14 = vcmp.gt.f32.partialorder %v4139_v60, 0.0  ;;  %vm426_vm0 = vcmp.gt.f32.partialorder %v4163_v33, 0.0 }
  0xf8   : > { %2019 = vadd.xlane.f32.xlu1 %v2018_v5  ;;  %v1959_v5 = vadd.f32 %v1958_v25, %v1957_v61  ;;  %v4078_v61 = vld [vmem:[%s3883_s8 + $0x98] sm:$0xff]  ;;  %v2030_v25 = vsel %vm1382_vm12, %v1988_v35, 0.0 }
  0xf9   : > { %v484_v50 = vmin.f32 %v4078_v61, 0.0  ;;  %vm420_vm9 = vcmp.gt.f32.partialorder %v4078_v61, 0.0 }
  0xfa   : > { %v1960_v56 = vrot.slane %v1959_v5, 1 }
  0xfb   : > { %v535_v30 = vmul.f32 1.442695, %v484_v50 }
  0xfc   : > { %2028 = vadd.xlane.f32.xlu1 %v2027_v22  ;;  %v489_v22 = vmin.f32 %v4063_v59, 0.0  ;;  %v4111_v26 = vadd.f32 %v1960_v56, %v1959_v5  ;;  %v1992_v5 = vmul.f32 %v4003_v20, %v4104_v38  ;;  %v1994_v56 = vmul.f32 %v4003_v20, %v4131_v24 }
  0xfe   : > { %2016 = vadd.xlane.f32.xlu0 %v2015_v54  ;;  %v2045_v54 = vsel %vm1382_vm12, %v1993_v46, 0.0  ;;  %v545_v39 = vmul.f32 1.442695, %v489_v22  ;;  %v1999_v17 = vmul.f32 %v4111_v26, %v4121_v40  ;;  %v4142_v22 = vld [vmem:[%s3883_s8 + $0xf0] sm:$0xff]  ;;  %v2048_v6 = vsel %vm1382_vm12, %v1994_v56, 0.0 }
  0xff   : > { %vm431_vm15 = vcmp.gt.f32.partialorder %v4142_v22, 0.0 }
 0x100   : > { %2034 = vadd.xlane.f32.xlu1 %v2033_v49  ;;  %v1990_v49 = vmul.f32 %v3931_v62, %v4082_v43  ;;  %v2051_v62 = vsel %vm1382_vm12, %v1995_v51, 0.0  ;;  %3125 = vpow2.f32 %v545_v39 }
 0x101   : > { %3127 = vpow2.f32 %v535_v30  ;;  %v387_v30 = vld [vmem:[%s3565_s30 + $0x90] sm:$0xff] }
 0x102   : > { %2022 = vadd.xlane.f32.xlu0 %v2021_v45  ;;  %v1978_v45 = vadd.f32 %v1977_v52, %v3860_v13  ;;  %v3114_v13 = vpop.eup %3113  ;;  %v2036_v37 = vsel %vm1382_vm12, %v1990_v49, 0.0  ;;  %v2042_v52 = vsel %vm1382_vm12, %v1992_v5, 0.0  ;;  %3129 = vpow2.f32 %v549_v44  ;;  %v395_v5 = vld [vmem:[%s3565_s30 + $0xd0] sm:$0xff] }
 0x103   : > { %v3116_v46 = vpop.eup %3115  ;;  %v4146_v11 = vsel %vm419_vm1, %v451_v21, %v3114_v13  ;;  %v495_v21 = vmin.f32 %v4142_v22, 0.0  ;;  %v2063_v49 = vsel %vm1382_vm12, %v1999_v17, 0.0  ;;  %v4191_v17 = vld [vmem:[%s3883_s8 + $0xd8] sm:$0xff] }
 0x104   : > { %2040 = vadd.xlane.f32.xlu1 %v2039_v10  ;;  %v486_v10 = vmin.f32 %v4108_v55, 0.0  ;;  %v1979_v35 = vrot.slane %v1978_v45, 2  ;;  %v3118_v41 = vpop.eup %3117  ;;  %v2001_v3 = vmul.f32 %v4111_v26, %v4146_v11  ;;  %vm428_vm1 = vcmp.gt.f32.partialorder %v4191_v17, 0.0 }
 0x105   : > { %v3120_v50 = vpop.eup %3119  ;;  %v4167_v16 = vsel %vm421_vm3, %v453_v42, %v3118_v41  ;;  %v490_v42 = vmin.f32 %v4163_v33, 0.0  ;;  %v557_v1 = vmul.f32 1.442695, %v495_v21 }
 0x106   : > { %2025 = vadd.xlane.f32.xlu0 %v2024_v0  ;;  %v493_v0 = vmin.f32 %v4117_v9, 0.0  ;;  %v539_v51 = vmul.f32 1.442695, %v486_v10  ;;  %v3122_v39 = vpop.eup %3121  ;;  %v4180_v13 = vsel %vm416_vm4, %v448_v12, %v3120_v50  ;;  %v396_v10 = vld [vmem:[%s3565_s30 + $0xd8] sm:$0xff]  ;;  %v457_v12 = vadd.f32 1.0, %v4063_v59 }
 0x107   : > { %v3124_v44 = vpop.eup %3123  ;;  %v4195_v41 = vsel %vm423_vm6, %v455_v19, %v3122_v39  ;;  %v1998_v21 = vmul.f32 %v4003_v20, %v4180_v13  ;;  %v2963_v50 = vpack.c.bf16 %v396_v10, %v395_v5 }
 0x108   : > { %2046 = vadd.xlane.f32.xlu1 %v2045_v54  ;;  %v4155_v54 = vsel %vm414_vm2, %v446_v23, %v3116_v46  ;;  %v553_v47 = vmul.f32 1.442695, %v493_v0  ;;  %3131 = vpow2.f32 %v539_v51  ;;  %v543_v46 = vmul.f32 1.442695, %v488_v7 }
 0x109   : > { %v1996_v23 = vmul.f32 %v4003_v20, %v4155_v54  ;;  %v4210_v19 = vsel %vm418_vm7, %v450_v2, %v3124_v44  ;;  %v492_v20 = vmin.f32 %v4191_v17, 0.0  ;;  %v2005_v5 = vmul.f32 %v4111_v26, %v4195_v41  ;;  %v391_v44 = vld [vmem:[%s3565_s30 + $0xb0] sm:$0xff] }
 0x10a   : > { %2031 = vadd.xlane.f32.xlu0 %v2030_v25  ;;  %v1980_v25 = vadd.f32 %v1979_v35, %v1978_v45  ;;  %3133 = vpow2.f32 %v553_v47  ;;  %v2069_v35 = vsel %vm1382_vm12, %v2001_v3, 0.0  ;;  %v3126_v56 = vpop.eup %3125  ;;  %v4205_v3 = vld [vmem:[%s3883_s8 + $0xe8] sm:$0xff] }
 0x10b   : > { %v2054_v7 = vsel %vm1382_vm12, %v1996_v23, 0.0  ;;  %v3128_v39 = vpop.eup %3127  ;;  %3135 = vpow2.f32 %v543_v46  ;;  %v547_v23 = vmul.f32 1.442695, %v490_v42  ;;  %v4225_v2 = vsel %vm425_vm8, %v457_v12, %v3126_v56 }
 0x10c   : > { %2052 = vadd.xlane.f32.xlu1 %v2051_v62  ;;  %v1981_v0 = vrot.slane %v1980_v25, 1  ;;  %3137 = vpow2.f32 %v557_v1  ;;  %v3130_v58 = vpop.eup %3129  ;;  %v2060_v46 = vsel %vm1382_vm12, %v1998_v21, 0.0  ;;  %v400_v1 = vld [vmem:[%s3565_s30 + $0xf8] sm:$0xff]  ;;  %v551_v12 = vmul.f32 1.442695, %v492_v20 }
 0x10d   : > { %3139 = vpow2.f32 %v547_v23  ;;  %v454_v21 = vadd.f32 1.0, %v4108_v55  ;;  %vm430_vm2 = vcmp.gt.f32.partialorder %v4205_v3, 0.0 }
 0x10e   : > { %2037 = vadd.xlane.f32.xlu0 %v2036_v37  ;;  %v388_v37 = vld [vmem:[%s3565_s30 + $0x98] sm:$0xff]  ;;  %3141 = vpow2.f32 %v551_v12 }
 0x10f   : > { %v2947_v63 = vpack.c.bf16 %v388_v37, %v387_v30  ;;  %v4216_v30 = vadd.f32 %v1981_v0, %v1980_v25  ;;  %v459_v25 = vadd.f32 1.0, %v4090_v53  ;;  %v494_v0 = vmin.f32 %v4205_v3, 0.0 }
 0x110   : > { %2058 = vadd.xlane.f32.xlu1 %v2057_v34  ;;  %v2003_v34 = vmul.f32 %v4111_v26, %v4167_v16 }
 0x112   : > { %2043 = vadd.xlane.f32.xlu0 %v2042_v52  ;;  %v452_v52 = vadd.f32 1.0, %v4078_v61  ;;  %v2075_v37 = vsel %vm1382_vm12, %v2003_v34, 0.0  ;;  %v399_v34 = vld [vmem:[%s3565_s30 + $0xf0] sm:$0xff]  ;;  %v3132_v56 = vpop.eup %3131 }
 0x114   : > { %2064 = vadd.xlane.f32.xlu1 %v2063_v49  ;;  %v389_v49 = vld [vmem:[%s3565_s30 + $0xa0] sm:$0xff] }
 0x115   : > { %v1011_v45 = vpop.trf.xlu1  ;;  %v881_v62 = vpop.trf.xlu0 }
 0x116   : > { %2049 = vadd.xlane.f32.xlu0 %v2048_v6  ;;  %2781 = vmatprep.mubr.msk.f32.mxu1 %vm897_vm5, %v1011_v45  ;;  %v390_v45 = vld [vmem:[%s3565_s30 + $0xa8] sm:$0xff] }
 0x117   : > { %2759 = vmatprep.mubr.msk.f32.mxu0 %vm897_vm5, %v881_v62  ;;  %v397_v62 = vld [vmem:[%s3565_s30 + $0xe0] sm:$0xff]  ;;  %v398_v6 = vld [vmem:[%s3565_s30 + $0xe8] sm:$0xff]  ;;  %v2951_v59 = vpack.c.bf16 %v390_v45, %v389_v49  ;;  %v4250_v49 = vld [vmem:[%s3883_s8 + $0xf8] sm:$0xff]  ;;  %v3134_v45 = vpop.eup %3133 }
 0x118   : > { %2070 = vadd.xlane.f32.xlu1 %v2069_v35  ;;  %v2967_v42 = vpack.c.bf16 %v398_v6, %v397_v62  ;;  %v2000_v35 = vmul.f32 %v4111_v26, %v4210_v19  ;;  %v4254_v62 = vsel %vm427_vm10, %v459_v25, %v3130_v58  ;;  %v461_v6 = vadd.f32 1.0, %v4117_v9 }
 0x119   : > { %v1012_v51 = vpop.trf.xlu1  ;;  %v882_v47 = vpop.trf.xlu0  ;;  %v4270_v58 = vsel %vm422_vm11, %v454_v21, %v3132_v56  ;;  %v456_v25 = vadd.f32 1.0, %v4139_v60  ;;  %vm432_vm3 = vcmp.gt.f32.partialorder %v4250_v49, 0.0 }
 0x11a   : > { %2055 = vadd.xlane.f32.xlu0 %v2054_v7  ;;  %2760 = vmatmul.mubr.msk.f32.vlgmr.msra.gmra.mrb[0].mxu0 %vm897_vm5, %v882_v47  ;;  %v2007_v47 = vmul.f32 %v4216_v30, %v4225_v2  ;;  %v4246_v7 = vsel %vm420_vm9, %v452_v52, %v3128_v39  ;;  %v555_v39 = vmul.f32 1.442695, %v494_v0  ;;  %v2066_v53 = vsel %vm1382_vm12, %v2000_v35, 0.0 }
 0x11b   : > { %2782 = vmatmul.mubr.msk.f32.vlgmr.msra.gmra.mrb[0].mxu1 %vm897_vm5, %v1012_v51  ;;  %2946 = vmatpush3.bf16.msra.mxu0 %v3847_v18  ;;  %v2081_v51 = vsel %vm1382_vm12, %v2005_v5, 0.0  ;;  %v2002_v20 = vmul.f32 %v4111_v26, %v4246_v7  ;;  %v2009_v5 = vmul.f32 %v4216_v30, %v4254_v62 }
 0x11c   : > { %2076 = vadd.xlane.f32.xlu1 %v2075_v37  ;;  %2962 = vmatpush3.bf16.msra.mxu1 %v3855_v27  ;;  %v392_v27 = vld [vmem:[%s3565_s30 + $0xb8] sm:$0xff]  ;;  %v2087_v37 = vsel %vm1382_vm12, %v2007_v47, 0.0  ;;  %3143 = vpow2.f32 %v555_v39  ;;  %v460_v47 = vadd.f32 1.0, %v4191_v17  ;;  %v464_v39 = vadd.f32 1.0, %v4250_v49 }
 0x11d   : > { %v1013_v18 = vpop.trf.xlu1  ;;  %v883_v10 = vpop.trf.xlu0  ;;  %2948 = vmatprep.subr.bf16.mxu0 %v2947_v63  ;;  %2964 = vmatprep.subr.bf16.mxu1 %v2963_v50  ;;  %v2955_v52 = vpack.c.bf16 %v392_v27, %v391_v44  ;;  %v2072_v55 = vsel %vm1382_vm12, %v2002_v20, 0.0  ;;  %v2093_v9 = vsel %vm1382_vm12, %v2009_v5, 0.0 }
 0x11e   : > { %2061 = vadd.xlane.f32.xlu0 %v2060_v46  ;;  %2784 = vmatprep.mubr.msk.f32.mxu1 %vm897_vm5, %v1013_v18  ;;  %v3136_v18 = vpop.eup %3135  ;;  %v463_v46 = vadd.f32 1.0, %v4142_v22 }
 0x11f   : > { %2762 = vmatprep.mubr.msk.f32.mxu0 %vm897_vm5, %v883_v10  ;;  %2950 = vmatpush3.bf16.msra.mxu0 %v2947_v63  ;;  %v2971_v63 = vpack.c.bf16 %v400_v1, %v399_v34  ;;  %v4275_v10 = vsel %vm429_vm13, %v461_v6, %v3134_v45  ;;  %v3138_v44 = vpop.eup %3137  ;;  %v4286_v35 = vsel %vm424_vm14, %v456_v25, %v3136_v18 }
 0x120   : > { %2082 = vadd.xlane.f32.xlu1 %v2081_v51  ;;  %2966 = vmatpush3.bf16.msra.mxu1 %v2963_v50  ;;  %v496_v50 = vmin.f32 %v4250_v49, 0.0  ;;  %v2011_v60 = vmul.f32 %v4216_v30, %v4275_v10  ;;  %v3140_v22 = vpop.eup %3139  ;;  %v4289_v27 = vsel %vm431_vm15, %v463_v46, %v3138_v44  ;;  %v2006_v1 = vmul.f32 %v4111_v26, %v4286_v35 }
 0x121   : > { %v1014_v23 = vpop.trf.xlu1  ;;  %v884_v61 = vpop.trf.xlu0  ;;  %2952 = vmatprep.subr.bf16.mxu0 %v2951_v59  ;;  %2968 = vmatprep.subr.bf16.mxu1 %v2967_v42  ;;  %v2013_v56 = vmul.f32 %v4216_v30, %v4289_v27 }
 0x122   : > { %2763 = vmatmul.mubr.msk.f32.gmra.mrb[2].mxu0 %vm897_vm5, %v884_v61  ;;  %2785 = vmatmul.mubr.msk.f32.gmra.mrb[2].mxu1 %vm897_vm5, %v1014_v23  ;;  %v559_v0 = vmul.f32 1.442695, %v496_v50  ;;  %v2099_v12 = vsel %vm1382_vm12, %v2011_v60, 0.0  ;;  %v3142_v21 = vpop.eup %3141  ;;  %v462_v23 = vadd.f32 1.0, %v4205_v3 }
 0x123   : > { %2067 = vadd.xlane.f32.xlu0 %v2066_v53  ;;  %2954 = vmatpush3.bf16.msra.mxu0 %v2951_v59  ;;  %v2004_v59 = vmul.f32 %v4111_v26, %v4270_v58  ;;  %v2105_v45 = vsel %vm1382_vm12, %v2013_v56, 0.0  ;;  %v4306_v6 = vsel %vm428_vm1, %v460_v47, %v3142_v21  ;;  %v4346_v47 = vld [vmem:[%s4343_s11 + $0x8] sm:$0xff] }
 0x124   : > { %2088 = vadd.xlane.f32.xlu1 %v2087_v37  ;;  %2970 = vmatpush3.bf16.msra.mxu1 %v2967_v42  ;;  %v458_v42 = vadd.f32 1.0, %v4163_v33  ;;  %3145 = vpow2.f32 %v559_v0  ;;  %v2084_v33 = vsel %vm1382_vm12, %v2006_v1, 0.0  ;;  %v2010_v17 = vmul.f32 %v4216_v30, %v4306_v6 }
 0x125   : > { %2956 = vmatprep.subr.bf16.mxu0 %v2955_v52  ;;  %2972 = vmatprep.subr.bf16.mxu1 %v2971_v63  ;;  %v2078_v34 = vsel %vm1382_vm12, %v2004_v59, 0.0 }
 0x126   : > { %v4298_v51 = vsel %vm426_vm0, %v458_v42, %v3140_v22  ;;  %v3144_v61 = vpop.eup %3143  ;;  %v2096_v3 = vsel %vm1382_vm12, %v2010_v17, 0.0 }
 0x127   : > { %2073 = vadd.xlane.f32.xlu0 %v2072_v55  ;;  %2958 = vmatpush3.bf16.msra.mxu0 %v2955_v52  ;;  %v2008_v26 = vmul.f32 %v4216_v30, %v4298_v51 }
 0x128   : > { %2094 = vadd.xlane.f32.xlu1 %v2093_v9  ;;  %2974 = vmatpush3.bf16.msra.mxu1 %v2971_v63  ;;  %v4313_v63 = vsel %vm430_vm2, %v462_v23, %v3144_v61 }
 0x129   : > { %v2090_v52 = vsel %vm1382_vm12, %v2008_v26, 0.0  ;;  %v2012_v37 = vmul.f32 %v4216_v30, %v4313_v63 }
 0x12b   : > { %2079 = vadd.xlane.f32.xlu0 %v2078_v34  ;;  %v2102_v49 = vsel %vm1382_vm12, %v2012_v37, 0.0 }
 0x12c   : > { %2100 = vadd.xlane.f32.xlu1 %v2099_v12 }
 0x12e   : > { %v3146_v53 = vpop.eup %3145 }
 0x12f   : > { %2085 = vadd.xlane.f32.xlu0 %v2084_v33  ;;  %v4322_v5 = vsel %vm432_vm3, %v464_v39, %v3146_v53 }
 0x130   : > { %2106 = vadd.xlane.f32.xlu1 %v2105_v45  ;;  %v2014_v46 = vmul.f32 %v4216_v30, %v4322_v5 }
 0x132   : > { %v2108_v59 = vsel %vm1382_vm12, %v2014_v46, 0.0 }
 0x133   : > { %2091 = vadd.xlane.f32.xlu0 %v2090_v52  ;;  %v4350_v52 = vld [vmem:[%s4343_s11 + $0x20] sm:$0xff] }
 0x135   : > { %v1269_v20 = vpop.trf.xlu1  ;;  %v1140_v50 = vpop.trf.xlu0 }
 0x136   : > { %2803 = vmatprep.mubr.msk.f32.mxu0 %vm897_vm5, %v1140_v50  ;;  %2825 = vmatprep.mubr.msk.f32.mxu1 %vm897_vm5, %v1269_v20  ;;  %v4353_v20 = vld [vmem:[%s4343_s11] sm:$0xff] }
 0x137   : > { %2097 = vadd.xlane.f32.xlu0 %v2096_v3 }
 0x139   : > { %v1270_v25 = vpop.trf.xlu1  ;;  %v1141_v18 = vpop.trf.xlu0 }
 0x13a   : > { %2804 = vmatmul.mubr.msk.f32.vlgmr.msra.gmra.mrb[4].mxu0 %vm897_vm5, %v1141_v18  ;;  %2826 = vmatmul.mubr.msk.f32.vlgmr.msra.gmra.mrb[4].mxu1 %vm897_vm5, %v1270_v25  ;;  %v4357_v18 = vld [vmem:[%s4343_s11 + $0x30] sm:$0xff] }
 0x13b   : > { %2103 = vadd.xlane.f32.xlu0 %v2102_v49 }
 0x13d   : > { %v1271_v44 = vpop.trf.xlu1  ;;  %v1142_v55 = vpop.trf.xlu0 }
 0x13e   : > { %2806 = vmatprep.mubr.msk.f32.mxu0 %vm897_vm5, %v1142_v55  ;;  %2828 = vmatprep.mubr.msk.f32.mxu1 %vm897_vm5, %v1271_v44 }
 0x13f   : > { %2109 = vadd.xlane.f32.xlu0 %v2108_v59  ;;  %v4361_v59 = vld [vmem:[%s4343_s11 + $0x10] sm:$0xff] }
 0x141   : > { %v1272_v0 = vpop.trf.xlu1  ;;  %v1143_v9 = vpop.trf.xlu0 }
 0x142   : > { %2807 = vmatmul.mubr.msk.f32.gmra.mrb[6].mxu0 %vm897_vm5, %v1143_v9  ;;  %2829 = vmatmul.mubr.msk.f32.gmra.mrb[6].mxu1 %vm897_vm5, %v1272_v0 }
 0x143   : > { %2839 = vmatprep.mubr.msk.f32.mxu0 %vm1382_vm12, %v3969_v28  ;;  %2859 = vmatprep.mubr.msk.f32.mxu1 %vm1382_vm12, %v4014_v8 }
 0x185   : > { %v2020_v30 = vpop.xlane.xlu1 %2019 }
 0x186   : > { %v2112_v60 = vadd.f32 1e-06, %v2020_v30 }
 0x188   : > { %3147 = vrcp.f32 %v2112_v60 }
 0x189   : > { %v2029_v42 = vpop.xlane.xlu1 %2028 }
 0x18a   : > { %v2115_v22 = vadd.f32 1e-06, %v2029_v42 }
 0x18b   : > { %v2017_v34 = vpop.xlane.xlu0 %2016 }
 0x18c   : > { %3149 = vrcp.f32 %v2115_v22  ;;  %v2111_v1 = vadd.f32 1e-06, %v2017_v34 }
 0x18d   : > { %v2035_v28 = vpop.xlane.xlu1 %2034 }
 0x18e   : > { %3151 = vrcp.f32 %v2111_v1  ;;  %v2117_v12 = vadd.f32 1e-06, %v2035_v28  ;;  %v4366_v28 = vld [vmem:[%s4343_s11 + $0x18] sm:$0xff] }
 0x18f   : > { %v2023_v8 = vpop.xlane.xlu0 %2022 }
 0x190   : > { %3153 = vrcp.f32 %v2117_v12  ;;  %v2113_v56 = vadd.f32 1e-06, %v2023_v8 }
 0x191   : > { %v2041_v21 = vpop.xlane.xlu1 %2040 }
 0x192   : > { %v3148_v33 = vpop.eup %3147  ;;  %3155 = vrcp.f32 %v2113_v56  ;;  %v2119_v26 = vadd.f32 1e-06, %v2041_v21 }
 0x193   : > { %v2026_v45 = vpop.xlane.xlu0 %2025  ;;  %v2216_v23 = vmul.f32 %v3148_v33, %v4346_v47 }
 0x194   : > { %3157 = vrcp.f32 %v2119_v26  ;;  %v2114_v61 = vadd.f32 1e-06, %v2026_v45 }
 0x195   : > { %v2047_v17 = vpop.xlane.xlu1 %2046  ;;  %2254 = vperm.xlu0 %3017, %v2216_v23  }
 0x196   : > { %v3150_v39 = vpop.eup %3149  ;;  %3159 = vrcp.f32 %v2114_v61  ;;  %v2121_v53 = vadd.f32 1e-06, %v2047_v17  ;;  %v4371_v61 = vld [vmem:[%s4343_s11 + $0x28] sm:$0xff] }
 0x197   : > { %v2032_v50 = vpop.xlane.xlu0 %2031  ;;  %v2219_v3 = vmul.f32 %v3150_v39, %v4350_v52 }
 0x198   : > { %v3152_v37 = vpop.eup %3151  ;;  %3161 = vrcp.f32 %v2121_v53  ;;  %v2116_v25 = vadd.f32 1e-06, %v2032_v50 }
 0x199   : > { %v2053_v49 = vpop.xlane.xlu1 %2052  ;;  %2269 = vperm.xlu0 %3017, %v2219_v3   ;;  %v2215_v46 = vmul.f32 %v3152_v37, %v4353_v20 }
 0x19a   : > { %v3154_v44 = vpop.eup %3153  ;;  %3163 = vrcp.f32 %v2116_v25  ;;  %v2123_v55 = vadd.f32 1e-06, %v2053_v49 }
 0x19b   : > { %2249 = vperm.xlu1 %3018, %v2215_v46   ;;  %v2038_v0 = vpop.xlane.xlu0 %2037  ;;  %v2221_v9 = vmul.f32 %v3154_v44, %v4357_v18  ;;  %v4376_v46 = vld [vmem:[%s4343_s11 + $0x38] sm:$0xff] }
 0x19c   : > { %v3156_v30 = vpop.eup %3155  ;;  %3165 = vrcp.f32 %v2123_v55  ;;  %v2118_v60 = vadd.f32 1e-06, %v2038_v0 }
 0x19d   : > { %v2059_v42 = vpop.xlane.xlu1 %2058  ;;  %2279 = vperm.xlu0 %3017, %v2221_v9   ;;  %v2217_v22 = vmul.f32 %v3156_v30, %v4361_v59 }
 0x19e   : > { %v3158_v34 = vpop.eup %3157  ;;  %3167 = vrcp.f32 %v2118_v60  ;;  %v2125_v1 = vadd.f32 1e-06, %v2059_v42 }
 0x19f   : > { %2259 = vperm.xlu1 %3018, %v2217_v22   ;;  %v2044_v12 = vpop.xlane.xlu0 %2043  ;;  %v2223_v8 = vmul.f32 %v3158_v34, %v4353_v20 }
 0x1a0   : > { %v3160_v56 = vpop.eup %3159  ;;  %3169 = vrcp.f32 %v2125_v1  ;;  %v2120_v21 = vadd.f32 1e-06, %v2044_v12 }
 0x1a1   : > { %v2065_v33 = vpop.xlane.xlu1 %2064  ;;  %2289 = vperm.xlu0 %3017, %v2223_v8   ;;  %v2218_v26 = vmul.f32 %v3160_v56, %v4366_v28 }
 0x1a2   : > { %v3162_v45 = vpop.eup %3161  ;;  %3171 = vrcp.f32 %v2120_v21  ;;  %v2127_v23 = vadd.f32 1e-06, %v2065_v33 }
 0x1a3   : > { %2264 = vperm.xlu1 %3018, %v2218_v26   ;;  %v2050_v17 = vpop.xlane.xlu0 %2049  ;;  %v2225_v39 = vmul.f32 %v3162_v45, %v4361_v59 }
 0x1a4   : > { %v3164_v53 = vpop.eup %3163  ;;  %3173 = vrcp.f32 %v2127_v23  ;;  %v2122_v50 = vadd.f32 1e-06, %v2050_v17 }
 0x1a5   : > { %v2071_v3 = vpop.xlane.xlu1 %2070  ;;  %2299 = vperm.xlu0 %3017, %v2225_v39   ;;  %v2220_v37 = vmul.f32 %v3164_v53, %v4371_v61 }
 0x1a6   : > { %v3166_v25 = vpop.eup %3165  ;;  %3175 = vrcp.f32 %v2122_v50  ;;  %v2129_v49 = vadd.f32 1e-06, %v2071_v3 }
 0x1a7   : > { %2274 = vperm.xlu1 %3018, %v2220_v37   ;;  %v2056_v44 = vpop.xlane.xlu0 %2055  ;;  %v2227_v55 = vmul.f32 %v3166_v25, %v4350_v52 }
 0x1a8   : > { %v3168_v0 = vpop.eup %3167  ;;  %3177 = vrcp.f32 %v2129_v49  ;;  %v2124_v9 = vadd.f32 1e-06, %v2056_v44 }
 0x1a9   : > { %v2077_v30 = vpop.xlane.xlu1 %2076  ;;  %2309 = vperm.xlu0 %3017, %v2227_v55   ;;  %v2222_v60 = vmul.f32 %v3168_v0, %v4376_v46 }
 0x1aa   : > { %v3170_v42 = vpop.eup %3169  ;;  %3179 = vrcp.f32 %v2124_v9  ;;  %v2131_v22 = vadd.f32 1e-06, %v2077_v30 }
 0x1ab   : > { %2284 = vperm.xlu1 %3018, %v2222_v60   ;;  %v2062_v34 = vpop.xlane.xlu0 %2061  ;;  %v2229_v1 = vmul.f32 %v3170_v42, %v4357_v18 }
 0x1ac   : > { %v3172_v12 = vpop.eup %3171  ;;  %3181 = vrcp.f32 %v2131_v22  ;;  %v2126_v8 = vadd.f32 1e-06, %v2062_v34 }
 0x1ad   : > { %v2083_v56 = vpop.xlane.xlu1 %2082  ;;  %2319 = vperm.xlu0 %3017, %v2229_v1   ;;  %v2224_v21 = vmul.f32 %v3172_v12, %v4346_v47 }
 0x1ae   : > { %v3174_v33 = vpop.eup %3173  ;;  %3183 = vrcp.f32 %v2126_v8  ;;  %v2133_v26 = vadd.f32 1e-06, %v2083_v56 }
 0x1af   : > { %2294 = vperm.xlu1 %3018, %v2224_v21   ;;  %v2231_v45 = vmul.f32 %v3174_v33, %v4353_v20 }
 0x1b0   : > { %v3176_v23 = vpop.eup %3175  ;;  %3185 = vrcp.f32 %v2133_v26  ;;  %v2068_v17 = vpop.xlane.xlu0 %2067 }
 0x1b1   : > { %v2128_v39 = vadd.f32 1e-06, %v2068_v17  ;;  %v2089_v53 = vpop.xlane.xlu1 %2088  ;;  %2329 = vperm.xlu0 %3017, %v2231_v45   ;;  %v2226_v50 = vmul.f32 %v3176_v23, %v4366_v28 }
 0x1b2   : > { %v3178_v3 = vpop.eup %3177  ;;  %v2135_v37 = vadd.f32 1e-06, %v2089_v53 }
 0x1b3   : > { %3187 = vrcp.f32 %v2128_v39  ;;  %2304 = vperm.xlu1 %3018, %v2226_v50   ;;  %v2233_v25 = vmul.f32 %v3178_v3, %v4361_v59 }
 0x1b4   : > { %v3180_v49 = vpop.eup %3179  ;;  %3189 = vrcp.f32 %v2135_v37  ;;  %v2074_v44 = vpop.xlane.xlu0 %2073 }
 0x1b5   : > { %v2130_v55 = vadd.f32 1e-06, %v2074_v44  ;;  %v2095_v0 = vpop.xlane.xlu1 %2094  ;;  %2339 = vperm.xlu0 %3017, %v2233_v25   ;;  %v2228_v9 = vmul.f32 %v3180_v49, %v4371_v61 }
 0x1b6   : > { %v3182_v30 = vpop.eup %3181  ;;  %v2137_v60 = vadd.f32 1e-06, %v2095_v0 }
 0x1b7   : > { %3191 = vrcp.f32 %v2130_v55  ;;  %2314 = vperm.xlu1 %3018, %v2228_v9   ;;  %v2235_v42 = vmul.f32 %v3182_v30, %v4350_v52 }
 0x1b8   : > { %v3184_v22 = vpop.eup %3183  ;;  %3193 = vrcp.f32 %v2137_v60  ;;  %v2080_v34 = vpop.xlane.xlu0 %2079 }
 0x1b9   : > { %v2132_v1 = vadd.f32 1e-06, %v2080_v34  ;;  %v2101_v12 = vpop.xlane.xlu1 %2100  ;;  %2349 = vperm.xlu0 %3017, %v2235_v42   ;;  %v2230_v8 = vmul.f32 %v3184_v22, %v4376_v46 }
 0x1ba   : > { %v3186_v56 = vpop.eup %3185  ;;  %v2139_v21 = vadd.f32 1e-06, %v2101_v12 }
 0x1bb   : > { %3195 = vrcp.f32 %v2132_v1  ;;  %2324 = vperm.xlu1 %3018, %v2230_v8   ;;  %v2237_v33 = vmul.f32 %v3186_v56, %v4357_v18 }
 0x1bc   : > { %3197 = vrcp.f32 %v2139_v21  ;;  %v2086_v26 = vpop.xlane.xlu0 %2085 }
 0x1bd   : > { %v3188_v45 = vpop.eup %3187  ;;  %v2134_v23 = vadd.f32 1e-06, %v2086_v26  ;;  %v2107_v17 = vpop.xlane.xlu1 %2106  ;;  %2359 = vperm.xlu0 %3017, %v2237_v33  }
 0x1be   : > { %v3190_v39 = vpop.eup %3189  ;;  %v2141_v53 = vadd.f32 1e-06, %v2107_v17  ;;  %v2232_v50 = vmul.f32 %v3188_v45, %v4346_v47 }
 0x1bf   : > { %3199 = vrcp.f32 %v2134_v23  ;;  %v2239_v3 = vmul.f32 %v3190_v39, %v4353_v20 }
 0x1c0   : > { %3201 = vrcp.f32 %v2141_v53  ;;  %2334 = vperm.xlu1 %3018, %v2232_v50   ;;  %v2092_v37 = vpop.xlane.xlu0 %2091 }
 0x1c1   : > { %v3192_v25 = vpop.eup %3191  ;;  %v2136_v49 = vadd.f32 1e-06, %v2092_v37  ;;  %2369 = vperm.xlu0 %3017, %v2239_v3  }
 0x1c2   : > { %v3194_v44 = vpop.eup %3193  ;;  %v2234_v55 = vmul.f32 %v3192_v25, %v4366_v28 }
 0x1c3   : > { %3203 = vrcp.f32 %v2136_v49  ;;  %v2241_v0 = vmul.f32 %v3194_v44, %v4361_v59 }
 0x1c4   : > { %2344 = vperm.xlu1 %3018, %v2234_v55   ;;  %v2098_v9 = vpop.xlane.xlu0 %2097 }
 0x1c5   : > { %v3196_v30 = vpop.eup %3195  ;;  %v2138_v60 = vadd.f32 1e-06, %v2098_v9  ;;  %2379 = vperm.xlu0 %3017, %v2241_v0  }
 0x1c6   : > { %v3198_v42 = vpop.eup %3197  ;;  %v2236_v20 = vmul.f32 %v3196_v30, %v4371_v61 }
 0x1c7   : > { %3205 = vrcp.f32 %v2138_v60  ;;  %v2243_v22 = vmul.f32 %v3198_v42, %v4350_v52 }
 0x1c8   : > { %2354 = vperm.xlu1 %3018, %v2236_v20   ;;  %v2104_v34 = vpop.xlane.xlu0 %2103 }
 0x1c9   : > { %v3200_v1 = vpop.eup %3199  ;;  %v2140_v12 = vadd.f32 1e-06, %v2104_v34  ;;  %2389 = vperm.xlu0 %3017, %v2243_v22  }
 0x1ca   : > { %v3202_v8 = vpop.eup %3201  ;;  %v2238_v56 = vmul.f32 %v3200_v1, %v4376_v46 }
 0x1cb   : > { %3207 = vrcp.f32 %v2140_v12  ;;  %v2245_v59 = vmul.f32 %v3202_v8, %v4357_v18 }
 0x1cc   : > { %2364 = vperm.xlu1 %3018, %v2238_v56   ;;  %v2110_v21 = vpop.xlane.xlu0 %2109 }
 0x1cd   : > { %v3204_v33 = vpop.eup %3203  ;;  %v2142_v26 = vadd.f32 1e-06, %v2110_v21  ;;  %2399 = vperm.xlu0 %3017, %v2245_v59  }
 0x1ce   : > { %v2240_v45 = vmul.f32 %v3204_v33, %v4346_v47 }
 0x1cf   : > { %3209 = vrcp.f32 %v2142_v26 }
 0x1d0   : > { %2374 = vperm.xlu1 %3018, %v2240_v45  }
 0x1d1   : > { %v3206_v52 = vpop.eup %3205 }
 0x1d2   : > { %v2242_v23 = vmul.f32 %v3206_v52, %v4366_v28 }
 0x1d4   : > { %2384 = vperm.xlu1 %3018, %v2242_v23  }
 0x1d5   : > { %v3208_v17 = vpop.eup %3207 }
 0x1d6   : > { %v2244_v39 = vmul.f32 %v3208_v17, %v4371_v61 }
 0x1d8   : > { %2394 = vperm.xlu1 %3018, %v2244_v39  }
 0x1d9   : > { %v3210_v53 = vpop.eup %3209 }
 0x1da   : > { %v2246_v18 = vmul.f32 %v3210_v53, %v4376_v46 }
 0x1dc   : > { %2404 = vperm.xlu1 %3018, %v2246_v18  }
 0x1ed   : > { %v2761_v50 = vpop.f32.mrb[0].mxu0 }
 0x1ee   : > { %v2783_v3 = vpop.f32.mrb[0].mxu1  ;;  %v976_v37 = vpop.f32.mrb[1].mxu0 }
 0x1ef   : > { %v2975_v25 = vpack.c.bf16 %v2761_v50, %v976_v37  ;;  %v1105_v49 = vpop.f32.mrb[1].mxu1 }
 0x1f0   : > { %v2983_v47 = vpack.c.bf16 %v2783_v3, %v1105_v49 }
 0x1f1   : > { %2976 = vmatprep.subr.bf16.mxu0 %v2975_v25 }
 0x1f2   : > { %2984 = vmatprep.subr.bf16.mxu1 %v2983_v47  ;;  %2978 = vmatpush3.bf16.msra.mxu0 %v2975_v25 }
 0x1f3   : > { %2986 = vmatpush3.bf16.msra.mxu1 %v2983_v47 }
 0x1f5   : > { %v2764_v28 = vpop.f32.mrb[2].mxu0  ;;  %v2786_v44 = vpop.f32.mrb[2].mxu1 }
 0x1f6   : > { %v986_v55 = vpop.f32.mrb[3].mxu0  ;;  %v1115_v0 = vpop.f32.mrb[3].mxu1 }
 0x1f7   : > { %v2979_v61 = vpack.c.bf16 %v2764_v28, %v986_v55  ;;  %v2987_v9 = vpack.c.bf16 %v2786_v44, %v1115_v0 }
 0x1f9   : > { %2980 = vmatprep.subr.bf16.mxu0 %v2979_v61  ;;  %2988 = vmatprep.subr.bf16.mxu1 %v2987_v9 }
 0x1fa   : > { %2982 = vmatpush3.bf16.msra.mxu0 %v2979_v61  ;;  %2990 = vmatpush3.bf16.msra.mxu1 %v2987_v9 }
 0x1fd   : > { %2840 = vmatmul.mubr.msk.f32.vlgmr.msra.gmra.mrb[8].mxu0 %vm1382_vm12, %v3936_v29  ;;  %2860 = vmatmul.mubr.msk.f32.vlgmr.msra.gmra.mrb[8].mxu1 %vm1382_vm12, %v4104_v38 }
 0x1fe   : > { %2842 = vmatprep.mubr.msk.f32.mxu0 %vm1382_vm12, %v4000_v31  ;;  %2862 = vmatprep.mubr.msk.f32.mxu1 %vm1382_vm12, %v4041_v32 }
 0x201   : > { %2843 = vmatmul.mubr.msk.f32.gmra.mrb[10].mxu0 %vm1382_vm12, %v4025_v14  ;;  %2863 = vmatmul.mubr.msk.f32.gmra.mrb[10].mxu1 %vm1382_vm12, %v4131_v24 }
 0x202   : > { %2845 = vmatprep.mubr.msk.f32.mxu0 %vm1382_vm12, %v3957_v36  ;;  %2865 = vmatprep.mubr.msk.f32.mxu1 %vm1382_vm12, %v4068_v57 }
 0x205   : > { %2846 = vmatmul.mubr.msk.f32.gmra.mrb[12].mxu0 %vm1382_vm12, %v4052_v4  ;;  %2866 = vmatmul.mubr.msk.f32.gmra.mrb[12].mxu1 %vm1382_vm12, %v4155_v54 }
 0x206   : > { %2848 = vmatprep.mubr.msk.f32.mxu0 %vm1382_vm12, %v3984_v48  ;;  %2868 = vmatprep.mubr.msk.f32.mxu1 %vm1382_vm12, %v4094_v15 }
 0x209   : > { %2849 = vmatmul.mubr.msk.f32.gmra.mrb[14].mxu0 %vm1382_vm12, %v4082_v43  ;;  %2869 = vmatmul.mubr.msk.f32.gmra.mrb[14].mxu1 %vm1382_vm12, %v4180_v13 }
 0x20a   : > { %2899 = vmatprep.mubr.msk.f32.mxu1 %vm1382_vm12, %v4225_v2  ;;  %2879 = vmatprep.mubr.msk.f32.mxu0 %vm1382_vm12, %v4121_v40 }
 0x20d   : > { %v2805_v29 = vpop.f32.mrb[4].mxu0  ;;  %v2827_v36 = vpop.f32.mrb[4].mxu1 }
 0x20e   : > { %v1234_v31 = vpop.f32.mrb[5].mxu0  ;;  %v1363_v14 = vpop.f32.mrb[5].mxu1 }
 0x20f   : > { %v2991_v48 = vpack.c.bf16 %v2805_v29, %v1234_v31  ;;  %v2999_v32 = vpack.c.bf16 %v2827_v36, %v1363_v14 }
 0x211   : > { %2992 = vmatprep.subr.bf16.mxu0 %v2991_v48  ;;  %3000 = vmatprep.subr.bf16.mxu1 %v2999_v32 }
 0x212   : > { %2994 = vmatpush3.bf16.msra.mxu0 %v2991_v48  ;;  %3002 = vmatpush3.bf16.msra.mxu1 %v2999_v32 }
 0x214   : > { %v2255_v54 = vpop.permute.xlu0 %2254 }
 0x215   : > { %v2808_v4 = vpop.f32.mrb[6].mxu0  ;;  %v2830_v57 = vpop.f32.mrb[6].mxu1 }
 0x216   : > { %v1244_v43 = vpop.f32.mrb[7].mxu0  ;;  %v1373_v15 = vpop.f32.mrb[7].mxu1 }
 0x217   : > { %v2995_v38 = vpack.c.bf16 %v2808_v4, %v1244_v43  ;;  %v3003_v24 = vpack.c.bf16 %v2830_v57, %v1373_v15 }
 0x218   : > { %v2270_v13 = vpop.permute.xlu0 %2269 }
 0x219   : > { %2996 = vmatprep.subr.bf16.mxu0 %v2995_v38  ;;  %3004 = vmatprep.subr.bf16.mxu1 %v3003_v24 }
 0x21a   : > { %3006 = vmatpush3.bf16.msra.mxu1 %v3003_v24  ;;  %2998 = vmatpush3.bf16.msra.mxu0 %v2995_v38  ;;  %v2250_v40 = vpop.permute.xlu1 %2249 }
 0x21c   : > { %v2280_v2 = vpop.permute.xlu0 %2279 }
 0x21d   : > { %2880 = vmatmul.mubr.msk.f32.vlgmr.msra.gmra.mrb[16].mxu0 %vm1382_vm12, %v4210_v19  ;;  %2900 = vmatmul.mubr.msk.f32.vlgmr.msra.gmra.mrb[16].mxu1 %vm1382_vm12, %v4298_v51 }
 0x21e   : > { %2902 = vmatprep.mubr.msk.f32.mxu1 %vm1382_vm12, %v4254_v62  ;;  %2882 = vmatprep.mubr.msk.f32.mxu0 %vm1382_vm12, %v4146_v11  ;;  %v2260_v11 = vpop.permute.xlu1 %2259 }
 0x220   : > { %v2290_v62 = vpop.permute.xlu0 %2289 }
 0x221   : > { %2883 = vmatmul.mubr.msk.f32.gmra.mrb[18].mxu0 %vm1382_vm12, %v4246_v7  ;;  %2903 = vmatmul.mubr.msk.f32.gmra.mrb[18].mxu1 %vm1382_vm12, %v4306_v6 }
 0x222   : > { %2905 = vmatprep.mubr.msk.f32.mxu1 %vm1382_vm12, %v4275_v10  ;;  %2885 = vmatprep.mubr.msk.f32.mxu0 %vm1382_vm12, %v4167_v16  ;;  %v2265_v16 = vpop.permute.xlu1 %2264 }
 0x224   : > { %v2300_v10 = vpop.permute.xlu0 %2299 }
 0x225   : > { %2886 = vmatmul.mubr.msk.f32.gmra.mrb[20].mxu0 %vm1382_vm12, %v4270_v58  ;;  %2906 = vmatmul.mubr.msk.f32.gmra.mrb[20].mxu1 %vm1382_vm12, %v4313_v63 }
 0x226   : > { %2908 = vmatprep.mubr.msk.f32.mxu1 %vm1382_vm12, %v4289_v27  ;;  %2888 = vmatprep.mubr.msk.f32.mxu0 %vm1382_vm12, %v4195_v41  ;;  %v2275_v19 = vpop.permute.xlu1 %2274 }
 0x228   : > { %v2310_v41 = vpop.permute.xlu0 %2309 }
 0x229   : > { %2889 = vmatmul.mubr.msk.f32.gmra.mrb[22].mxu0 %vm1382_vm12, %v4286_v35  ;;  %2909 = vmatmul.mubr.msk.f32.gmra.mrb[22].mxu1 %vm1382_vm12, %v4322_v5 }
 0x22a   : > { %v2285_v7 = vpop.permute.xlu1 %2284 }
 0x22c   : > { %v2320_v6 = vpop.permute.xlu0 %2319 }
 0x22e   : > { %v2295_v58 = vpop.permute.xlu1 %2294 }
 0x230   : > { %v4461_v63 = vpop.permute.xlu0 %2329 }
 0x232   : > { %v2305_v27 = vpop.permute.xlu1 %2304 }
 0x234   : > { %v4469_v12 = vpop.permute.xlu0 %2339 }
 0x236   : > { %v2315_v51 = vpop.permute.xlu1 %2314 }
 0x238   : > { %v2350_v49 = vpop.permute.xlu0 %2349 }
 0x23a   : > { %v2325_v35 = vpop.permute.xlu1 %2324 }
 0x23c   : > { %v2360_v31 = vpop.permute.xlu0 %2359 }
 0x23f   : > { %v2335_v5 = vpop.permute.xlu1 %2334 }
 0x240   : > { %v2370_v48 = vpop.permute.xlu0 %2369 }
 0x243   : > { %v4471_v8 = vpop.permute.xlu1 %2344 }
 0x244   : > { %v2380_v4 = vpop.permute.xlu0 %2379 }
 0x247   : > { %v2355_v47 = vpop.permute.xlu1 %2354 }
 0x24b   : > { %v2365_v14 = vpop.permute.xlu1 %2364 }
 0x24f   : > { %v2375_v32 = vpop.permute.xlu1 %2374 }
 0x253   : > { %v2385_v57 = vpop.permute.xlu1 %2384 }
 0x2d0   : > { %v2841_v46 = vpop.f32.mrb[8].mxu0  ;;  %v2861_v30 = vpop.f32.mrb[8].mxu1 }
 0x2d1   : > { %v2408_v60 = vmul.f32 %v2841_v46, %v2255_v54  ;;  %v2416_v42 = vmul.f32 %v2861_v30, %v2295_v58  ;;  %v1473_v20 = vpop.f32.mrb[9].mxu0  ;;  %v1602_v22 = vpop.f32.mrb[9].mxu1 }
 0x2d2   : > { %v2407_v34 = vmul.f32 %v2250_v40, %v1473_v20  ;;  %v2415_v1 = vmul.f32 %v2290_v62, %v1602_v22 }
 0x2d3   : > { %2440 = vst.msk [vmem:[%s4467_s14 + $0x8] sm:$0xff] %vm1382_vm12, %v2408_v60  ;;  %2448 = vst.msk [vmem:[%s4467_s14 + $0x48] sm:$0xff] %vm1382_vm12, %v2416_v42 }
 0x2d4   : > { %2439 = vst.msk [vmem:[%s4467_s14] sm:$0xff] %vm1382_vm12, %v2407_v34  ;;  %2447 = vst.msk [vmem:[%s4467_s14 + $0x40] sm:$0xff] %vm1382_vm12, %v2415_v1  ;;  %v2844_v56 = vpop.f32.mrb[10].mxu0  ;;  %v2864_v59 = vpop.f32.mrb[10].mxu1 }
 0x2d5   : > { %v2410_v21 = vmul.f32 %v2844_v56, %v2265_v16  ;;  %v2418_v33 = vmul.f32 %v2864_v59, %v2305_v27  ;;  %v1483_v26 = vpop.f32.mrb[11].mxu0  ;;  %v1612_v45 = vpop.f32.mrb[11].mxu1 }
 0x2d6   : > { %v2409_v52 = vmul.f32 %v2260_v11, %v1483_v26  ;;  %v2417_v23 = vmul.f32 %v2300_v10, %v1612_v45 }
 0x2d7   : > { %2442 = vst.msk [vmem:[%s4467_s14 + $0x18] sm:$0xff] %vm1382_vm12, %v2410_v21  ;;  %2450 = vst.msk [vmem:[%s4467_s14 + $0x58] sm:$0xff] %vm1382_vm12, %v2418_v33 }
 0x2d8   : > { %2441 = vst.msk [vmem:[%s4467_s14 + $0x10] sm:$0xff] %vm1382_vm12, %v2409_v52  ;;  %2449 = vst.msk [vmem:[%s4467_s14 + $0x50] sm:$0xff] %vm1382_vm12, %v2417_v23  ;;  %v2847_v17 = vpop.f32.mrb[12].mxu0  ;;  %v2867_v39 = vpop.f32.mrb[12].mxu1 }
 0x2d9   : > { %v2412_v53 = vmul.f32 %v2847_v17, %v2275_v19  ;;  %v2420_v18 = vmul.f32 %v2867_v39, %v2315_v51  ;;  %v1493_v50 = vpop.f32.mrb[13].mxu0  ;;  %v1622_v3 = vpop.f32.mrb[13].mxu1 }
 0x2da   : > { %v2411_v37 = vmul.f32 %v2270_v13, %v1493_v50  ;;  %v2419_v25 = vmul.f32 %v2310_v41, %v1622_v3  ;;  %v2390_v13 = vpop.permute.xlu0 %2389  ;;  %v2395_v19 = vpop.permute.xlu1 %2394 }
 0x2db   : > { %2444 = vst.msk [vmem:[%s4467_s14 + $0x28] sm:$0xff] %vm1382_vm12, %v2412_v53  ;;  %2452 = vst.msk [vmem:[%s4467_s14 + $0x68] sm:$0xff] %vm1382_vm12, %v2420_v18 }
 0x2dc   : > { %2443 = vst.msk [vmem:[%s4467_s14 + $0x20] sm:$0xff] %vm1382_vm12, %v2411_v37  ;;  %2451 = vst.msk [vmem:[%s4467_s14 + $0x60] sm:$0xff] %vm1382_vm12, %v2419_v25  ;;  %v2850_v28 = vpop.f32.mrb[14].mxu0  ;;  %v2870_v44 = vpop.f32.mrb[14].mxu1 }
 0x2dd   : > { %v2414_v55 = vmul.f32 %v2850_v28, %v2285_v7  ;;  %v2422_v0 = vmul.f32 %v2870_v44, %v2325_v35  ;;  %v1503_v61 = vpop.f32.mrb[15].mxu0  ;;  %v1632_v9 = vpop.f32.mrb[15].mxu1 }
 0x2de   : > { %v2413_v29 = vmul.f32 %v2280_v2, %v1503_v61  ;;  %v2421_v36 = vmul.f32 %v2320_v6, %v1632_v9  ;;  %v2400_v20 = vpop.permute.xlu0 %2399  ;;  %v2405_v22 = vpop.permute.xlu1 %2404 }
 0x2df   : > { %2446 = vst.msk [vmem:[%s4467_s14 + $0x38] sm:$0xff] %vm1382_vm12, %v2414_v55  ;;  %2454 = vst.msk [vmem:[%s4467_s14 + $0x78] sm:$0xff] %vm1382_vm12, %v2422_v0 }
 0x2e0   : > { %2445 = vst.msk [vmem:[%s4467_s14 + $0x30] sm:$0xff] %vm1382_vm12, %v2413_v29  ;;  %2453 = vst.msk [vmem:[%s4467_s14 + $0x70] sm:$0xff] %vm1382_vm12, %v2421_v36 }
 0x2f0   : > { %v2881_v43 = vpop.f32.mrb[16].mxu0  ;;  %v2901_v15 = vpop.f32.mrb[16].mxu1 }
 0x2f1   : > { %v2424_v38 = vmul.f32 %v2881_v43, %v2335_v5  ;;  %v2432_v24 = vmul.f32 %v2901_v15, %v2375_v32  ;;  %v1731_v40 = vpop.f32.mrb[17].mxu0  ;;  %v1860_v11 = vpop.f32.mrb[17].mxu1 }
 0x2f2   : > { %v2423_v54 = vmul.f32 %v4461_v63, %v1731_v40  ;;  %v2431_v16 = vmul.f32 %v2370_v48, %v1860_v11 }
 0x2f3   : > { %2456 = vst.msk [vmem:[%s4467_s14 + $0x88] sm:$0xff] %vm1382_vm12, %v2424_v38  ;;  %2464 = vst.msk [vmem:[%s4467_s14 + $0xc8] sm:$0xff] %vm1382_vm12, %v2432_v24 }
 0x2f4   : > { %2455 = vst.msk [vmem:[%s4467_s14 + $0x80] sm:$0xff] %vm1382_vm12, %v2423_v54  ;;  %2463 = vst.msk [vmem:[%s4467_s14 + $0xc0] sm:$0xff] %vm1382_vm12, %v2431_v16  ;;  %v2884_v2 = vpop.f32.mrb[18].mxu0  ;;  %v2904_v7 = vpop.f32.mrb[18].mxu1 }
 0x2f5   : > { %v2426_v62 = vmul.f32 %v2884_v2, %v4471_v8  ;;  %v2434_v58 = vmul.f32 %v2904_v7, %v2385_v57  ;;  %v1741_v10 = vpop.f32.mrb[19].mxu0  ;;  %v1870_v27 = vpop.f32.mrb[19].mxu1 }
 0x2f6   : > { %v2425_v41 = vmul.f32 %v4469_v12, %v1741_v10  ;;  %v2433_v51 = vmul.f32 %v2380_v4, %v1870_v27 }
 0x2f7   : > { %2458 = vst.msk [vmem:[%s4467_s14 + $0x98] sm:$0xff] %vm1382_vm12, %v2426_v62  ;;  %2466 = vst.msk [vmem:[%s4467_s14 + $0xd8] sm:$0xff] %vm1382_vm12, %v2434_v58 }
 0x2f8   : > { %2457 = vst.msk [vmem:[%s4467_s14 + $0x90] sm:$0xff] %vm1382_vm12, %v2425_v41  ;;  %2465 = vst.msk [vmem:[%s4467_s14 + $0xd0] sm:$0xff] %vm1382_vm12, %v2433_v51  ;;  %v2887_v6 = vpop.f32.mrb[20].mxu0  ;;  %v2907_v35 = vpop.f32.mrb[20].mxu1 }
 0x2f9   : > { %v2428_v63 = vmul.f32 %v2887_v6, %v2355_v47  ;;  %v2436_v5 = vmul.f32 %v2907_v35, %v2395_v19  ;;  %v1751_v46 = vpop.f32.mrb[21].mxu0  ;;  %v1880_v30 = vpop.f32.mrb[21].mxu1 }
 0x2fa   : > { %v2427_v60 = vmul.f32 %v2350_v49, %v1751_v46  ;;  %v2435_v42 = vmul.f32 %v2390_v13, %v1880_v30 }
 0x2fb   : > { %2460 = vst.msk [vmem:[%s4467_s14 + $0xa8] sm:$0xff] %vm1382_vm12, %v2428_v63  ;;  %2468 = vst.msk [vmem:[%s4467_s14 + $0xe8] sm:$0xff] %vm1382_vm12, %v2436_v5 }
 0x2fc   : > { %2459 = vst.msk [vmem:[%s4467_s14 + $0xa0] sm:$0xff] %vm1382_vm12, %v2427_v60  ;;  %2467 = vst.msk [vmem:[%s4467_s14 + $0xe0] sm:$0xff] %vm1382_vm12, %v2435_v42  ;;  %v2890_v34 = vpop.f32.mrb[22].mxu0  ;;  %v2910_v1 = vpop.f32.mrb[22].mxu1 }
 0x2fd   : > { %v2430_v12 = vmul.f32 %v2890_v34, %v2365_v14  ;;  %v2438_v8 = vmul.f32 %v2910_v1, %v2405_v22  ;;  %v1761_v56 = vpop.f32.mrb[23].mxu0  ;;  %v1890_v59 = vpop.f32.mrb[23].mxu1 }
 0x2fe   : > { %v2429_v21 = vmul.f32 %v2360_v31, %v1761_v56  ;;  %v2437_v33 = vmul.f32 %v2400_v20, %v1890_v59 }
 0x2ff   : > { %2462 = vst.msk [vmem:[%s4467_s14 + $0xb8] sm:$0xff] %vm1382_vm12, %v2430_v12  ;;  %2470 = vst.msk [vmem:[%s4467_s14 + $0xf8] sm:$0xff] %vm1382_vm12, %v2438_v8 }
 0x300   : > { %2461 = vst.msk [vmem:[%s4467_s14 + $0xb0] sm:$0xff] %vm1382_vm12, %v2429_v21  ;;  %2469 = vst.msk [vmem:[%s4467_s14 + $0xf0] sm:$0xff] %vm1382_vm12, %v2437_v33 }
 0x301 PF: > { %s15_s18 = sadd.s32 1, %s3217_s18  }
 0x302   : > { %p12_p4 = scmp.ge.s32.totalorder %s15_s18, 4  }
 0x304   :  { %14 = sbr.rel (!%p12_p4) target bundleno = 1 (0x1), region = 82 }

</bundles_post_ra>
